<compile_context>
chip_gen: v7x
topology: tpu7x:2x2x1
jax: 0.10.0
libtpu: 0.0.40
codegen_flags: <defaults>
</compile_context>

<pallas_src>
import functools
import math

import jax
import jax.numpy as jnp
from jax.experimental import pallas as pl
from jax.experimental.pallas import tpu as pltpu

# ----------------------------- static config --------------------------------
EOS_IDX = 3                      # DeepCAD command vocabulary: Line,Arc,Circle,EOS,SOL,Ext
N_COMMANDS = 6                   # cfg.cad_n_commands
N_ARGS = 16
ARGS_DIM = 32                    # cfg.args_dim (kept small for the example)
N_CLASS = ARGS_DIM + 1           # cfg.args_dim + 1
TOLERANCE = 3
ALPHA = 2.0
LOSS_WEIGHTS = {"loss_cmd_weight": 1.0, "loss_args_weight": 2.0}

# CAD_CMD_ARGS_MASK buffer (deterministic, DeepCAD convention: 6 cmds x 16 args)
CAD_CMD_ARGS_MASK = jnp.array(
    [[1, 1, 0, 0, 0, 0, 0, 0, 0, 0, 0, 0, 0, 0, 0, 0],   # Line
     [1, 1, 1, 1, 0, 0, 0, 0, 0, 0, 0, 0, 0, 0, 0, 0],   # Arc
     [1, 1, 0, 0, 1, 0, 0, 0, 0, 0, 0, 0, 0, 0, 0, 0],   # Circle
     [0] * 16,                                            # EOS
     [0] * 16,                                            # SOL
     [0, 0, 0, 0, 0, 1, 1, 1, 1, 1, 1, 1, 1, 1, 1, 1]],  # Extrude
    dtype=jnp.float32)


# ------------------------------ kernel ---------------------------------------
def _cad_loss_kernel(cmd_logits_ref, cmd_aux_ref, args_logits_ref, args_aux_ref,
                     cmd_num_ref, cmd_den_ref, args_num_ref, args_den_ref):
    step = pl.program_id(0)

    @pl.when(step == 0)
    def _():
        cmd_num_ref[...] = jnp.zeros_like(cmd_num_ref)
        cmd_den_ref[...] = jnp.zeros_like(cmd_den_ref)
        args_num_ref[...] = jnp.zeros_like(args_num_ref)
        args_den_ref[...] = jnp.zeros_like(args_den_ref)

    # ------------------- command cross-entropy (tc rows) ---------------------
    clog = cmd_logits_ref[...].astype(jnp.float32)                  # (tc, 6)
    caux = cmd_aux_ref[...]                                          # (tc, 2) f32
    ctgt = caux[:, 0:1]                                              # target class id
    cmsk = caux[:, 1:2]                                              # 0/1 padding mask
    cmax = jnp.max(clog, axis=-1, keepdims=True)
    clse = cmax + jnp.log(jnp.sum(jnp.exp(clog - cmax), axis=-1, keepdims=True))
    ccls = jax.lax.broadcasted_iota(jnp.int32, clog.shape, 1).astype(jnp.float32)
    c_logit_t = jnp.sum(jnp.where(ccls == ctgt, clog, 0.0), axis=-1, keepdims=True)
    cnll = clse - c_logit_t                                          # -log softmax[target]
    # where(): a partial tail block carries garbage logits; its mask rows are exactly
    # zero (aux is padded), and select() keeps NaN/Inf out of the sum (NaN*0 == NaN).
    cmd_num_ref[...] += jnp.sum(jnp.where(cmsk > 0.0, cnll * cmsk, 0.0),
                                axis=0, keepdims=True)
    cmd_den_ref[...] += jnp.sum(cmsk, axis=0, keepdims=True)

    # --------------------- gumbel soft-label args loss (tr rows) -------------
    alog = args_logits_ref[...].astype(jnp.float32)                  # (tr, 33)
    aaux = args_aux_ref[...]                                          # (tr, 2)
    atgt = aaux[:, 0:1] + 1.0                                         # target += 1
    amsk = aaux[:, 1:2]
    n_class = alog.shape[-1]

    amax = jnp.max(alog, axis=-1, keepdims=True)
    alse = amax + jnp.log(jnp.sum(jnp.exp(alog - amax), axis=-1, keepdims=True))
    logp = alog - alse        # log_softmax ( == log(softmax + 1e-9) to ~1e-9/p )

    acls = jax.lax.broadcasted_iota(jnp.int32, alog.shape, 1).astype(jnp.float32)
    d = jnp.abs(acls - atgt)
    # torch scatter_ loop (shifts -TOL..+TOL ascending, last write wins) closed form:
    #   w[c] = exp(-alpha*|c-t|) for |c-t| <= TOL, else 0,
    # except the top class: its final write is always shift=+TOL whenever any shift
    # clamps onto it, i.e. weight exp(-alpha*TOL) (even when t == n_class-1).  The
    # bottom clamp's last write coincides with the natural weight.  Folding the top
    # override into the distance: d -> max(d, TOL) on the last class only.
    d = jnp.where(acls == float(n_class - 1), jnp.maximum(d, float(TOLERANCE)), d)
    w = jnp.where(d <= float(TOLERANCE), jnp.exp(-ALPHA * d), 0.0)    # single EUP exp

    z = jnp.sum(w, axis=-1, keepdims=True)                            # (tr,1) > 0 valid rows
    s = jnp.sum(w * logp, axis=-1, keepdims=True)                     # (tr,1)
    lpp = -s / z                                                      # exact divide (torch parity)

    args_num_ref[...] += jnp.sum(jnp.where(amsk > 0.0, lpp * amsk, 0.0),
                                 axis=0, keepdims=True)
    args_den_ref[...] += jnp.sum(amsk, axis=0, keepdims=True)


# ------------------------------ wrapper ---------------------------------------
def _round_up(x, m):
    return ((x + m - 1) // m) * m


def _cad_masks(tgt_commands):
    """Visibility / extended padding mask / per-command args mask (plain-JAX glue)."""
    # TODO(synk): exact source of DeepCAD's _get_padding_mask_cad(extended=True) and
    # _get_visibility_mask was not provided; this follows the standard DeepCAD code.
    _, S = tgt_commands.shape
    visibility = jnp.sum((tgt_commands == EOS_IDX).astype(jnp.int32), axis=-1) < (S - 1)
    pm = (jnp.cumsum((tgt_commands == EOS_IDX).astype(jnp.int32), axis=-1) == 0)
    pm = pm.astype(jnp.float32)
    pm = pm.at[:, 1:].set(jnp.clip(pm[:, 1:] + pm[:, :-1], 0.0, 1.0))   # extended=True
    padding_mask = pm * visibility[:, None].astype(jnp.float32)          # (B, S)
    args_mask = CAD_CMD_ARGS_MASK[tgt_commands]                          # (B, S, N_ARGS)
    return padding_mask, args_mask


def new_cad_loss(command_logits, args_logits, tgt_commands, tgt_args, *, row_tile=8192):
    B, S, n_cmd = command_logits.shape
    _, _, n_args, n_class = args_logits.shape
    P = B * S
    R = P * n_args

    padding_mask, args_mask = _cad_masks(tgt_commands)

    # Natural (row-major) layouts: pure views, no HBM copy, no dtype upcast.
    cmd_logits_2d = command_logits.reshape(P, n_cmd)
    args_logits_2d = args_logits.reshape(R, n_class)

    # Row tile: multiple of 128 (hence of n_args=16).  The last logits block may be
    # partial; the tiny aux arrays are zero-padded to grid coverage so garbage rows
    # are masked out exactly.
    row_tile = max(128, (int(row_tile) // 128) * 128)
    tr = min(row_tile, _round_up(R, 128))
    grid = -(-R // tr)
    tc = tr // n_args
    R_cov = grid * tr
    P_cov = grid * tc

    # Per-row (target, mask) packed into a single (rows, 2) f32 aux array.
    args_aux = jnp.stack(
        [tgt_args.reshape(R).astype(jnp.float32),
         args_mask.reshape(R).astype(jnp.float32)], axis=-1)
    args_aux = jnp.pad(args_aux, ((0, R_cov - R), (0, 0)))
    cmd_aux = jnp.stack(
        [tgt_commands.reshape(P).astype(jnp.float32),
         padding_mask.reshape(P)], axis=-1)
    cmd_aux = jnp.pad(cmd_aux, ((0, P_cov - P), (0, 0)))

    out_scalar = jax.ShapeDtypeStruct((1, 1), jnp.float32)
    cmd_num, cmd_den, args_num, args_den = pl.pallas_call(
        _cad_loss_kernel,
        out_shape=(out_scalar, out_scalar, out_scalar, out_scalar),
        grid_spec=pltpu.PrefetchScalarGridSpec(
            num_scalar_prefetch=0,
            grid=(grid,),
            in_specs=[
                pl.BlockSpec((tc, n_cmd), lambda i: (i, 0)),     # cmd logits tile
                pl.BlockSpec((tc, 2), lambda i: (i, 0)),         # cmd (target, pad mask)
                pl.BlockSpec((tr, n_class), lambda i: (i, 0)),   # args logits tile
                pl.BlockSpec((tr, 2), lambda i: (i, 0)),         # args (target, mask)
            ],
            out_specs=[pl.BlockSpec((1, 1), lambda i: (0, 0))] * 4,   # resident scalars
        ),
        compiler_params=pltpu.CompilerParams(
            dimension_semantics=("arbitrary",),
            vmem_limit_bytes=32 * 1024 * 1024),
    )(cmd_logits_2d, cmd_aux, args_logits_2d, args_aux)

    # Same semantics as torch: divide by mask.sum() (NaN on a fully-padded batch).
    loss_cmd = cmd_num[0, 0] / cmd_den[0, 0]
    loss_args = args_num[0, 0] / args_den[0, 0]
    return {
        "loss_cmd": LOSS_WEIGHTS["loss_cmd_weight"] * loss_cmd,
        "loss_args": LOSS_WEIGHTS["loss_args_weight"] * loss_args,
    }


# -------------------------- pure-JAX reference --------------------------------
def new_cad_loss_reference(command_logits, args_logits, tgt_commands, tgt_args):
    padding_mask, args_mask = _cad_masks(tgt_commands)

    logp_cmd = jax.nn.log_softmax(command_logits.astype(jnp.float32), axis=-1)
    nll = -jnp.take_along_axis(logp_cmd, tgt_commands[..., None], axis=-1)[..., 0]
    loss_cmd = jnp.sum(nll * padding_mask) / jnp.sum(padding_mask)

    t = tgt_args + 1
    probs = jax.nn.softmax(args_logits.astype(jnp.float32), axis=-1)
    n_class = args_logits.shape[-1]
    dist = jnp.zeros_like(probs)
    for shift in range(-TOLERANCE, TOLERANCE + 1):                   # ascending, like torch
        idx = jnp.clip(t + shift, 0, n_class - 1)
        onehot = jax.nn.one_hot(idx, n_class, dtype=probs.dtype)
        dist = jnp.where(onehot > 0, math.exp(-ALPHA * abs(shift)), dist)  # last write wins
    dist = dist / jnp.sum(dist, axis=-1, keepdims=True)
    lpp = -jnp.sum(dist * jnp.log(probs + 1e-9), axis=-1)
    loss_args = jnp.sum(lpp * args_mask) / jnp.sum(args_mask)

    return {
        "loss_cmd": LOSS_WEIGHTS["loss_cmd_weight"] * loss_cmd,
        "loss_args": LOSS_WEIGHTS["loss_args_weight"] * loss_args,
    }


# -------------------------------- main ----------------------------------------
if __name__ == "__main__":
    key = jax.random.PRNGKey(0)
    B, S = 2, 8
    k1, k2, k3 = jax.random.split(key, 3)

    command_logits = jax.random.normal(k1, (B, S, N_COMMANDS), jnp.float32)
    args_logits = jax.random.normal(k2, (B, S, N_ARGS, N_CLASS), jnp.float32)

    # commands: a few real commands followed by EOS padding (DeepCAD convention)
    tgt_commands = jnp.array([[4, 0, 1, 2, 3, 3, 3, 3],
                              [4, 5, 0, 1, 2, 0, 3, 3]], dtype=jnp.int32)
    # args targets in [-1, args_dim - 1]  (+1 applied inside the kernel)
    tgt_args = jax.random.randint(k3, (B, S, N_ARGS), -1, ARGS_DIM, dtype=jnp.int32)
    # exercise the clamp boundaries on a masked-in (Line) position
    tgt_args = tgt_args.at[0, 1, 0].set(ARGS_DIM - 1)   # top class after +1
    tgt_args = tgt_args.at[0, 1, 1].set(-1)             # bottom class after +1

    # small row_tile so the example exercises multi-step accumulation (grid = 2)
    run = jax.jit(functools.partial(new_cad_loss, row_tile=128))
    res = run(command_logits, args_logits, tgt_commands, tgt_args)
    jax.block_until_ready(res)

    ref = jax.jit(new_cad_loss_reference)(command_logits, args_logits,
                                          tgt_commands, tgt_args)
    for name in ("loss_cmd", "loss_args"):
        a, b = float(res[name]), float(ref[name])
        assert abs(a - b) <= 1e-3 * max(1.0, abs(b)), (name, a, b)

    print("KERNEL_OK")
</pallas_src>

<mosaic_0001>
module attributes {stable_mosaic.version = 11 : i64} {
  func.func @_cad_loss_kernel(%arg0: i32, %arg1: memref<8x6xf32, #tpu.memory_space<vmem>>, %arg2: memref<8x2xf32, #tpu.memory_space<vmem>>, %arg3: memref<128x33xf32, #tpu.memory_space<vmem>>, %arg4: memref<128x2xf32, #tpu.memory_space<vmem>>, %arg5: memref<1x1xf32, #tpu.memory_space<vmem>>, %arg6: memref<1x1xf32, #tpu.memory_space<vmem>>, %arg7: memref<1x1xf32, #tpu.memory_space<vmem>>, %arg8: memref<1x1xf32, #tpu.memory_space<vmem>>) attributes {dimension_semantics = [#tpu.dimension_semantics<arbitrary>], iteration_bounds = array<i64: 2>, scalar_prefetch = 0 : i64, scratch_operands = 0 : i64, tpu.core_type = #tpu.core_type<tc>, window_params = [{transform_indices = @transform_0, window_bounds = array<i64: 8, 6>}, {transform_indices = @transform_1, window_bounds = array<i64: 8, 2>}, {transform_indices = @transform_2, window_bounds = array<i64: 128, 33>}, {transform_indices = @transform_3, window_bounds = array<i64: 128, 2>}, {pipeline_mode = #tpu.pipeline_mode<synchronous>, transform_indices = @transform_4, window_bounds = array<i64: 1, 1>}, {pipeline_mode = #tpu.pipeline_mode<synchronous>, transform_indices = @transform_5, window_bounds = array<i64: 1, 1>}, {pipeline_mode = #tpu.pipeline_mode<synchronous>, transform_indices = @transform_6, window_bounds = array<i64: 1, 1>}, {pipeline_mode = #tpu.pipeline_mode<synchronous>, transform_indices = @transform_7, window_bounds = array<i64: 1, 1>}]} {
    %c0_i32 = arith.constant 0 : i32
    %0 = arith.cmpi eq, %arg0, %c0_i32 : i32
    %1 = arith.extui %0 : i1 to i32
    %c0_i32_0 = arith.constant 0 : i32
    %2 = arith.cmpi ne, %1, %c0_i32_0 : i32
    scf.if %2 {
      %cst_46 = arith.constant 0.000000e+00 : f32
      %97 = vector.broadcast %cst_46 : f32 to vector<1x1xf32>
      %c0_47 = arith.constant 0 : index
      %c0_48 = arith.constant 0 : index
      %98 = vector.load %arg5[%c0_47, %c0_48] : memref<1x1xf32, #tpu.memory_space<vmem>>, vector<1x1xf32>
      tpu.vector_store %arg5[%c0_47, %c0_48], %97 {strides = array<i32>} : memref<1x1xf32, #tpu.memory_space<vmem>>, vector<1x1xf32>,
      %cst_49 = arith.constant 0.000000e+00 : f32
      %99 = vector.broadcast %cst_49 : f32 to vector<1x1xf32>
      %c0_50 = arith.constant 0 : index
      %c0_51 = arith.constant 0 : index
      %100 = vector.load %arg6[%c0_50, %c0_51] : memref<1x1xf32, #tpu.memory_space<vmem>>, vector<1x1xf32>
      tpu.vector_store %arg6[%c0_50, %c0_51], %99 {strides = array<i32>} : memref<1x1xf32, #tpu.memory_space<vmem>>, vector<1x1xf32>,
      %cst_52 = arith.constant 0.000000e+00 : f32
      %101 = vector.broadcast %cst_52 : f32 to vector<1x1xf32>
      %c0_53 = arith.constant 0 : index
      %c0_54 = arith.constant 0 : index
      %102 = vector.load %arg7[%c0_53, %c0_54] : memref<1x1xf32, #tpu.memory_space<vmem>>, vector<1x1xf32>
      tpu.vector_store %arg7[%c0_53, %c0_54], %101 {strides = array<i32>} : memref<1x1xf32, #tpu.memory_space<vmem>>, vector<1x1xf32>,
      %cst_55 = arith.constant 0.000000e+00 : f32
      %103 = vector.broadcast %cst_55 : f32 to vector<1x1xf32>
      %c0_56 = arith.constant 0 : index
      %c0_57 = arith.constant 0 : index
      %104 = vector.load %arg8[%c0_56, %c0_57] : memref<1x1xf32, #tpu.memory_space<vmem>>, vector<1x1xf32>
      tpu.vector_store %arg8[%c0_56, %c0_57], %103 {strides = array<i32>} : memref<1x1xf32, #tpu.memory_space<vmem>>, vector<1x1xf32>,
    } else {
    }
    %c0 = arith.constant 0 : index
    %c0_1 = arith.constant 0 : index
    %3 = vector.load %arg1[%c0, %c0_1] : memref<8x6xf32, #tpu.memory_space<vmem>>, vector<8x6xf32>
    %c0_2 = arith.constant 0 : index
    %c0_3 = arith.constant 0 : index
    %4 = vector.load %arg2[%c0_2, %c0_3] : memref<8x2xf32, #tpu.memory_space<vmem>>, vector<8x2xf32>
    %5 = vector.extract_strided_slice %4 {offsets = [0, 0], sizes = [8, 1], strides = [1, 1]} : vector<8x2xf32> to vector<8x1xf32>
    %6 = vector.extract_strided_slice %4 {offsets = [0, 1], sizes = [8, 1], strides = [1, 1]} : vector<8x2xf32> to vector<8x1xf32>
    %cst = arith.constant dense<0xFF800000> : vector<8xf32>
    %7 = vector.multi_reduction <maximumf>, %3, %cst [1] : vector<8x6xf32> to vector<8xf32>
    %8 = vector.shape_cast %7 : vector<8xf32> to vector<8x1xf32>
    %9 = vector.broadcast %8 : vector<8x1xf32> to vector<8x6xf32>
    %10 = arith.subf %3, %9 : vector<8x6xf32>
    %11 = math.exp %10 : vector<8x6xf32>
    %cst_4 = arith.constant dense<0.000000e+00> : vector<8xf32>
    %12 = vector.multi_reduction <add>, %11, %cst_4 [1] : vector<8x6xf32> to vector<8xf32>
    %13 = vector.shape_cast %12 : vector<8xf32> to vector<8x1xf32>
    %14 = math.log %13 : vector<8x1xf32>
    %15 = arith.addf %8, %14 : vector<8x1xf32>
    %16 = tpu.iota {dimensions = array<i32: 1>} : vector<8x6xi32>
    %17 = arith.sitofp %16 : vector<8x6xi32> to vector<8x6xf32>
    %18 = vector.broadcast %5 : vector<8x1xf32> to vector<8x6xf32>
    %19 = arith.cmpf oeq, %17, %18 : vector<8x6xf32>
    %cst_5 = arith.constant 0.000000e+00 : f32
    %20 = vector.broadcast %cst_5 : f32 to vector<8x6xf32>
    %21 = arith.select %19, %3, %20 : vector<8x6xi1>, vector<8x6xf32>
    %cst_6 = arith.constant dense<0.000000e+00> : vector<8xf32>
    %22 = vector.multi_reduction <add>, %21, %cst_6 [1] : vector<8x6xf32> to vector<8xf32>
    %23 = vector.shape_cast %22 : vector<8xf32> to vector<8x1xf32>
    %24 = arith.subf %15, %23 : vector<8x1xf32>
    %c0_7 = arith.constant 0 : index
    %c0_8 = arith.constant 0 : index
    %25 = vector.load %arg5[%c0_7, %c0_8] : memref<1x1xf32, #tpu.memory_space<vmem>>, vector<1x1xf32>
    %cst_9 = arith.constant 0.000000e+00 : f32
    %26 = vector.broadcast %cst_9 : f32 to vector<8x1xf32>
    %27 = arith.cmpf ogt, %6, %26 : vector<8x1xf32>
    %28 = arith.mulf %24, %6 : vector<8x1xf32>
    %cst_10 = arith.constant 0.000000e+00 : f32
    %29 = vector.broadcast %cst_10 : f32 to vector<8x1xf32>
    %30 = arith.select %27, %28, %29 : vector<8x1xi1>, vector<8x1xf32>
    %cst_11 = arith.constant dense<0.000000e+00> : vector<1xf32>
    %31 = vector.multi_reduction <add>, %30, %cst_11 [0] : vector<8x1xf32> to vector<1xf32>
    %32 = vector.shape_cast %31 : vector<1xf32> to vector<1x1xf32>
    %33 = arith.addf %25, %32 : vector<1x1xf32>
    %c0_12 = arith.constant 0 : index
    %c0_13 = arith.constant 0 : index
    %34 = vector.load %arg5[%c0_12, %c0_13] : memref<1x1xf32, #tpu.memory_space<vmem>>, vector<1x1xf32>
    tpu.vector_store %arg5[%c0_12, %c0_13], %33 {strides = array<i32>} : memref<1x1xf32, #tpu.memory_space<vmem>>, vector<1x1xf32>,
    %c0_14 = arith.constant 0 : index
    %c0_15 = arith.constant 0 : index
    %35 = vector.load %arg6[%c0_14, %c0_15] : memref<1x1xf32, #tpu.memory_space<vmem>>, vector<1x1xf32>
    %cst_16 = arith.constant dense<0.000000e+00> : vector<1xf32>
    %36 = vector.multi_reduction <add>, %6, %cst_16 [0] : vector<8x1xf32> to vector<1xf32>
    %37 = vector.shape_cast %36 : vector<1xf32> to vector<1x1xf32>
    %38 = arith.addf %35, %37 : vector<1x1xf32>
    %c0_17 = arith.constant 0 : index
    %c0_18 = arith.constant 0 : index
    %39 = vector.load %arg6[%c0_17, %c0_18] : memref<1x1xf32, #tpu.memory_space<vmem>>, vector<1x1xf32>
    tpu.vector_store %arg6[%c0_17, %c0_18], %38 {strides = array<i32>} : memref<1x1xf32, #tpu.memory_space<vmem>>, vector<1x1xf32>,
    %c0_19 = arith.constant 0 : index
    %c0_20 = arith.constant 0 : index
    %40 = vector.load %arg3[%c0_19, %c0_20] : memref<128x33xf32, #tpu.memory_space<vmem>>, vector<128x33xf32>
    %c0_21 = arith.constant 0 : index
    %c0_22 = arith.constant 0 : index
    %41 = vector.load %arg4[%c0_21, %c0_22] : memref<128x2xf32, #tpu.memory_space<vmem>>, vector<128x2xf32>
    %42 = vector.extract_strided_slice %41 {offsets = [0, 0], sizes = [128, 1], strides = [1, 1]} : vector<128x2xf32> to vector<128x1xf32>
    %cst_23 = arith.constant 1.000000e+00 : f32
    %43 = vector.broadcast %cst_23 : f32 to vector<128x1xf32>
    %44 = arith.addf %42, %43 : vector<128x1xf32>
    %45 = vector.extract_strided_slice %41 {offsets = [0, 1], sizes = [128, 1], strides = [1, 1]} : vector<128x2xf32> to vector<128x1xf32>
    %cst_24 = arith.constant dense<0xFF800000> : vector<128xf32>
    %46 = vector.multi_reduction <maximumf>, %40, %cst_24 [1] : vector<128x33xf32> to vector<128xf32>
    %47 = vector.shape_cast %46 : vector<128xf32> to vector<128x1xf32>
    %48 = vector.broadcast %47 : vector<128x1xf32> to vector<128x33xf32>
    %49 = arith.subf %40, %48 : vector<128x33xf32>
    %50 = math.exp %49 : vector<128x33xf32>
    %cst_25 = arith.constant dense<0.000000e+00> : vector<128xf32>
    %51 = vector.multi_reduction <add>, %50, %cst_25 [1] : vector<128x33xf32> to vector<128xf32>
    %52 = vector.shape_cast %51 : vector<128xf32> to vector<128x1xf32>
    %53 = math.log %52 : vector<128x1xf32>
    %54 = arith.addf %47, %53 : vector<128x1xf32>
    %55 = vector.broadcast %54 : vector<128x1xf32> to vector<128x33xf32>
    %56 = arith.subf %40, %55 : vector<128x33xf32>
    %57 = tpu.iota {dimensions = array<i32: 1>} : vector<128x33xi32>
    %58 = arith.sitofp %57 : vector<128x33xi32> to vector<128x33xf32>
    %59 = vector.broadcast %44 : vector<128x1xf32> to vector<128x33xf32>
    %60 = arith.subf %58, %59 : vector<128x33xf32>
    %61 = math.absf %60 : vector<128x33xf32>
    %cst_26 = arith.constant 3.200000e+01 : f32
    %62 = vector.broadcast %cst_26 : f32 to vector<128x33xf32>
    %63 = arith.cmpf oeq, %58, %62 : vector<128x33xf32>
    %cst_27 = arith.constant 3.000000e+00 : f32
    %64 = vector.broadcast %cst_27 : f32 to vector<128x33xf32>
    %65 = arith.maximumf %61, %64 : vector<128x33xf32>
    %66 = arith.select %63, %65, %61 : vector<128x33xi1>, vector<128x33xf32>
    %cst_28 = arith.constant 3.000000e+00 : f32
    %67 = vector.broadcast %cst_28 : f32 to vector<128x33xf32>
    %68 = arith.cmpf ole, %66, %67 : vector<128x33xf32>
    %cst_29 = arith.constant -2.000000e+00 : f32
    %69 = vector.broadcast %cst_29 : f32 to vector<128x33xf32>
    %70 = arith.mulf %69, %66 : vector<128x33xf32>
    %71 = math.exp %70 : vector<128x33xf32>
    %cst_30 = arith.constant 0.000000e+00 : f32
    %72 = vector.broadcast %cst_30 : f32 to vector<128x33xf32>
    %73 = arith.select %68, %71, %72 : vector<128x33xi1>, vector<128x33xf32>
    %cst_31 = arith.constant dense<0.000000e+00> : vector<128xf32>
    %74 = vector.multi_reduction <add>, %73, %cst_31 [1] : vector<128x33xf32> to vector<128xf32>
    %75 = vector.shape_cast %74 : vector<128xf32> to vector<128x1xf32>
    %76 = arith.mulf %73, %56 : vector<128x33xf32>
    %cst_32 = arith.constant dense<0.000000e+00> : vector<128xf32>
    %77 = vector.multi_reduction <add>, %76, %cst_32 [1] : vector<128x33xf32> to vector<128xf32>
    %78 = vector.shape_cast %77 : vector<128xf32> to vector<128x1xf32>
    %cst_33 = arith.constant 0.000000e+00 : f32
    %79 = vector.broadcast %cst_33 : f32 to vector<128x1xf32>
    %80 = arith.subf %79, %78 : vector<128x1xf32>
    %81 = arith.divf %80, %75 : vector<128x1xf32>
    %c0_34 = arith.constant 0 : index
    %c0_35 = arith.constant 0 : index
    %82 = vector.load %arg7[%c0_34, %c0_35] : memref<1x1xf32, #tpu.memory_space<vmem>>, vector<1x1xf32>
    %cst_36 = arith.constant 0.000000e+00 : f32
    %83 = vector.broadcast %cst_36 : f32 to vector<128x1xf32>
    %84 = arith.cmpf ogt, %45, %83 : vector<128x1xf32>
    %85 = arith.mulf %81, %45 : vector<128x1xf32>
    %cst_37 = arith.constant 0.000000e+00 : f32
    %86 = vector.broadcast %cst_37 : f32 to vector<128x1xf32>
    %87 = arith.select %84, %85, %86 : vector<128x1xi1>, vector<128x1xf32>
    %cst_38 = arith.constant dense<0.000000e+00> : vector<1xf32>
    %88 = vector.multi_reduction <add>, %87, %cst_38 [0] : vector<128x1xf32> to vector<1xf32>
    %89 = vector.shape_cast %88 : vector<1xf32> to vector<1x1xf32>
    %90 = arith.addf %82, %89 : vector<1x1xf32>
    %c0_39 = arith.constant 0 : index
    %c0_40 = arith.constant 0 : index
    %91 = vector.load %arg7[%c0_39, %c0_40] : memref<1x1xf32, #tpu.memory_space<vmem>>, vector<1x1xf32>
    tpu.vector_store %arg7[%c0_39, %c0_40], %90 {strides = array<i32>} : memref<1x1xf32, #tpu.memory_space<vmem>>, vector<1x1xf32>,
    %c0_41 = arith.constant 0 : index
    %c0_42 = arith.constant 0 : index
    %92 = vector.load %arg8[%c0_41, %c0_42] : memref<1x1xf32, #tpu.memory_space<vmem>>, vector<1x1xf32>
    %cst_43 = arith.constant dense<0.000000e+00> : vector<1xf32>
    %93 = vector.multi_reduction <add>, %45, %cst_43 [0] : vector<128x1xf32> to vector<1xf32>
    %94 = vector.shape_cast %93 : vector<1xf32> to vector<1x1xf32>
    %95 = arith.addf %92, %94 : vector<1x1xf32>
    %c0_44 = arith.constant 0 : index
    %c0_45 = arith.constant 0 : index
    %96 = vector.load %arg8[%c0_44, %c0_45] : memref<1x1xf32, #tpu.memory_space<vmem>>, vector<1x1xf32>
    tpu.vector_store %arg8[%c0_44, %c0_45], %95 {strides = array<i32>} : memref<1x1xf32, #tpu.memory_space<vmem>>, vector<1x1xf32>,
    return
  }
  func.func @transform_0(%arg0: i32) -> (i32, i32) {
    %c0_i32 = arith.constant 0 : i32
    %c0_i32_0 = arith.constant 0 : i32
    return %arg0, %c0_i32 : i32, i32
  }
  func.func @transform_1(%arg0: i32) -> (i32, i32) {
    %c0_i32 = arith.constant 0 : i32
    %c0_i32_0 = arith.constant 0 : i32
    return %arg0, %c0_i32 : i32, i32
  }
  func.func @transform_2(%arg0: i32) -> (i32, i32) {
    %c0_i32 = arith.constant 0 : i32
    %c0_i32_0 = arith.constant 0 : i32
    return %arg0, %c0_i32 : i32, i32
  }
  func.func @transform_3(%arg0: i32) -> (i32, i32) {
    %c0_i32 = arith.constant 0 : i32
    %c0_i32_0 = arith.constant 0 : i32
    return %arg0, %c0_i32 : i32, i32
  }
  func.func @transform_4(%arg0: i32) -> (i32, i32) {
    %c0_i32 = arith.constant 0 : i32
    %c0_i32_0 = arith.constant 0 : i32
    %c0_i32_1 = arith.constant 0 : i32
    return %c0_i32, %c0_i32_0 : i32, i32
  }
  func.func @transform_5(%arg0: i32) -> (i32, i32) {
    %c0_i32 = arith.constant 0 : i32
    %c0_i32_0 = arith.constant 0 : i32
    %c0_i32_1 = arith.constant 0 : i32
    return %c0_i32, %c0_i32_0 : i32, i32
  }
  func.func @transform_6(%arg0: i32) -> (i32, i32) {
    %c0_i32 = arith.constant 0 : i32
    %c0_i32_0 = arith.constant 0 : i32
    %c0_i32_1 = arith.constant 0 : i32
    return %c0_i32, %c0_i32_0 : i32, i32
  }
  func.func @transform_7(%arg0: i32) -> (i32, i32) {
    %c0_i32 = arith.constant 0 : i32
    %c0_i32_0 = arith.constant 0 : i32
    %c0_i32_1 = arith.constant 0 : i32
    return %c0_i32, %c0_i32_0 : i32, i32
  }
}

</mosaic_0001>

<bundles_post_ra>
// kernel: new_cad_loss.1
= control target key start
LH: loop header
LB: loop body
LE: loop exit
PB: predicated region body
PF: predicated region fallthrough
CT: control target
= control target key end

     0   :  { %13 = vsyncpa [#allocation3], 0  ;;  %s2413_s0 = inlined_call_operand.vmem [shape: f32[16,6], index: 0, kind: input, shape index: {}]   ;;  %s2414_s1 = inlined_call_operand.vmem [shape: f32[16,2], index: 1, kind: input, shape index: {}]   ;;  %s2415_s2 = inlined_call_operand.vmem [shape: f32[256,33], index: 2, kind: input, shape index: {}]   ;;  %s2416_s3 = inlined_call_operand.vmem [shape: f32[256,2], index: 3, kind: input, shape index: {}]   ;;  %s2417_s4 = inlined_call_operand.hbm [shape: f32[1,1], index: 4, kind: output, shape index: {0}]   ;;  %s2418_s5 = inlined_call_operand.hbm [shape: f32[1,1], index: 5, kind: output, shape index: {1}]   ;;  %s2419_s6 = inlined_call_operand.hbm [shape: f32[1,1], index: 6, kind: output, shape index: {2}]   ;;  %s2420_s7 = inlined_call_operand.hbm [shape: f32[1,1], index: 7, kind: output, shape index: {3}]  }
   0x1   :  { %14 = vsyncpa [#allocation5], 0 }
   0x2   :  { %15 = vsyncpa [#allocation8], 0  ;;  %s1755_s24 = smov 0  }
   0x3 LB: > { %s1761_s25 = sadd.s32 4294967295, %s1705_s24   ;;  %p1372_p0 = scmp.ge.s32.totalorder %s1705_s24, 1  ;;  %s1705_s24 = sphi %s1755_s24, %s21_s24  }
   0x4   : > { %p257_p1 = scmp.lt.s32.totalorder %s1705_s24, 3 }
   0x6   : > { %p258_p2 = pnand %p1372_p0, %p257_p1 }
   0x7   : > { %p297_p3 = scmp.lt.s32.totalorder (!%p258_p2), %s1761_s25, 1  ;;  %s1375_s26 = sshll.u32 (!%p258_p2), %s1761_s25, 4 }
   0x8   : > { %261 = sbr.rel (%p258_p2) target bundleno = 782 (0x30e), region = 36  ;;  %p306_p4 = scmp.lt.s32.totalorder (!%p258_p2), %s1375_s26, 31 }
   0x9   : > { %p1379_p5 = scmp.ne.s32.totalorder (!%p258_p2), %s1761_s25, 0 }
   0xf   : > { %s298_s27 = scalar_select %p297_p3, %s1761_s25, 1 }
  0x10   : > { %s2424_s26 = smov (!%p306_p4, %s1375_s26), 31  ;;  %320 = sbr.rel (%p1379_p5) target bundleno = 23 (0x17), region = 40 }
  0x11   : > { %s1373_s28 = sshll.u32 %s298_s27, 3  ;;  %s1376_s12 = sshll.u32 %s2424_s26, 3  ;;  %vm321_vm0 = vcmask (!%p1379_p5), 0   ;;  %v1707_v0 = vmov (!%p1379_p5), 0.0  }
  0x12   : > { %s1771_s8 = scalar_lea.vmem %s2413_s0, %s1373_s28  ;;  %s1776_s11 = scalar_lea.vmem %s2414_s1, %s1373_s28  ;;  %322 = vst.msk [vmem:[#allocation2] sm:$0x1] (!%p1379_p5), %vm321_vm0, %v1707_v0  ;;  %323 = vst.msk [vmem:[#allocation4] sm:$0x1] (!%p1379_p5), %vm321_vm0, %v1707_v0 }
  0x13   : > { %s1781_s15 = scalar_lea.vmem %s2415_s2, %s1376_s12  ;;  %s1786_s18 = scalar_lea.vmem %s2416_s3, %s1376_s12  ;;  %324 = vst.msk [vmem:[#allocation6] sm:$0x1] (!%p1379_p5), %vm321_vm0, %v1707_v0  ;;  %325 = vst.msk [vmem:[#allocation7] sm:$0x1] (!%p1379_p5), %vm321_vm0, %v1707_v0 }
  0x17 PF: > { %v1790_v1 = vld [vmem:[%s1781_s15] sm:$0xff]  ;;  %vm464_vm1 = vcmask 269312   ;;  %v1793_v2 = vld [vmem:[%s1781_s15 + $0x10] sm:$0xff]  ;;  %v1796_v3 = vld [vmem:[%s1781_s15 + $0x8] sm:$0xff]  ;;  %v1708_v7 = vmov 0   ;;  %vm328_vm2 = vcmask 48128  }
  0x18   : > { %v465_v4 = vsel %vm464_vm1, %v1790_v1, -inf  ;;  %v471_v5 = vsel %vm464_vm1, %v1793_v2, -inf  ;;  %v1803_v6 = vld [vmem:[%s1781_s15 + $0x18] sm:$0xff]  ;;  %1431 = vset.pattern.permute.xlu1 %v1708_v7  ;;  %1430 = vset.pattern.permute.xlu0 %v1708_v7  ;;  %v468_v8 = vsel %vm464_vm1, %v1796_v3, -inf  ;;  %v1810_v10 = vld [vmem:[%s1781_s15 + $0x28] sm:$0xff]  ;;  %v1813_v11 = vld [vmem:[%s1781_s15 + $0x20] sm:$0xff] }
  0x19   : > { %466 = vmax.xlane.f32.xlu0 %v465_v4  ;;  %472 = vmax.xlane.f32.xlu1 %v471_v5  ;;  %v474_v9 = vsel %vm464_vm1, %v1803_v6, -inf  ;;  %v480_v12 = vsel %vm464_vm1, %v1810_v10, -inf  ;;  %v477_v13 = vsel %vm464_vm1, %v1813_v11, -inf  ;;  %v1820_v14 = vld [vmem:[%s1781_s15 + $0x38] sm:$0xff]  ;;  %v1823_v15 = vld [vmem:[%s1781_s15 + $0x30] sm:$0xff]  ;;  %v1830_v18 = vld [vmem:[%s1781_s15 + $0x48] sm:$0xff] }
  0x1a   : > { %v486_v16 = vsel %vm464_vm1, %v1820_v14, -inf  ;;  %v483_v17 = vsel %vm464_vm1, %v1823_v15, -inf  ;;  %v1833_v19 = vld [vmem:[%s1781_s15 + $0x40] sm:$0xff]  ;;  %v492_v20 = vsel %vm464_vm1, %v1830_v18, -inf  ;;  %v1840_v22 = vld [vmem:[%s1781_s15 + $0x58] sm:$0xff]  ;;  %v1843_v23 = vld [vmem:[%s1781_s15 + $0x50] sm:$0xff] }
  0x1b   : > { %v489_v21 = vsel %vm464_vm1, %v1833_v19, -inf  ;;  %v498_v24 = vsel %vm464_vm1, %v1840_v22, -inf  ;;  %v495_v25 = vsel %vm464_vm1, %v1843_v23, -inf  ;;  %v1850_v26 = vld [vmem:[%s1781_s15 + $0x68] sm:$0xff]  ;;  %v1853_v27 = vld [vmem:[%s1781_s15 + $0x60] sm:$0xff]  ;;  %v1860_v30 = vld [vmem:[%s1781_s15 + $0x78] sm:$0xff] }
  0x1c   : > { %v504_v28 = vsel %vm464_vm1, %v1850_v26, -inf  ;;  %v501_v29 = vsel %vm464_vm1, %v1853_v27, -inf  ;;  %v1863_v31 = vld [vmem:[%s1781_s15 + $0x70] sm:$0xff]  ;;  %v510_v32 = vsel %vm464_vm1, %v1860_v30, -inf  ;;  %v433_v34 = vld [vmem:[%s1786_s18 + $0x8] sm:$0xff]  ;;  %v432_v37 = vld [vmem:[%s1786_s18] sm:$0xff] }
  0x1d   : > { %469 = vmax.xlane.f32.xlu0 %v468_v8  ;;  %475 = vmax.xlane.f32.xlu1 %v474_v9  ;;  %v507_v33 = vsel %vm464_vm1, %v1863_v31, -inf  ;;  %v449_v35 = vadd.f32 1.0, %v433_v34  ;;  %v434_v36 = vld [vmem:[%s1786_s18 + $0x10] sm:$0xff]  ;;  %v435_v39 = vld [vmem:[%s1786_s18 + $0x18] sm:$0xff]  ;;  %v448_v40 = vadd.f32 1.0, %v432_v37  ;;  %v436_v42 = vld [vmem:[%s1786_s18 + $0x20] sm:$0xff] }
  0x1e   : > { %v450_v38 = vadd.f32 1.0, %v434_v36  ;;  %v451_v41 = vadd.f32 1.0, %v435_v39  ;;  %v452_v43 = vadd.f32 1.0, %v436_v42  ;;  %v437_v44 = vld [vmem:[%s1786_s18 + $0x28] sm:$0xff]  ;;  %v438_v46 = vld [vmem:[%s1786_s18 + $0x30] sm:$0xff]  ;;  %v439_v48 = vld [vmem:[%s1786_s18 + $0x38] sm:$0xff] }
  0x1f   : > { %v453_v45 = vadd.f32 1.0, %v437_v44  ;;  %v454_v47 = vadd.f32 1.0, %v438_v46  ;;  %v455_v49 = vadd.f32 1.0, %v439_v48  ;;  %v440_v50 = vld [vmem:[%s1786_s18 + $0x40] sm:$0xff]  ;;  %v441_v52 = vld [vmem:[%s1786_s18 + $0x48] sm:$0xff]  ;;  %v442_v54 = vld [vmem:[%s1786_s18 + $0x50] sm:$0xff] }
  0x20   : > { %v456_v51 = vadd.f32 1.0, %v440_v50  ;;  %v457_v53 = vadd.f32 1.0, %v441_v52  ;;  %v1881_v55 = vld [vmem:[%s1771_s8] sm:$0xff]  ;;  %v458_v56 = vadd.f32 1.0, %v442_v54  ;;  %v443_v57 = vld [vmem:[%s1786_s18 + $0x58] sm:$0xff]  ;;  %v445_v62 = vld [vmem:[%s1786_s18 + $0x68] sm:$0xff] }
  0x21   : > { %481 = vmax.xlane.f32.xlu1 %v480_v12  ;;  %478 = vmax.xlane.f32.xlu0 %v477_v13  ;;  %v329_v58 = vsel %vm328_vm2, %v1881_v55, -inf  ;;  %v459_v59 = vadd.f32 1.0, %v443_v57  ;;  %v444_v60 = vld [vmem:[%s1786_s18 + $0x60] sm:$0xff]  ;;  %v461_v63 = vadd.f32 1.0, %v445_v62  ;;  %s1710_s19 = smov 127   ;;  %p1406_p6 = scmp.eq.s32.totalorder %s1761_s25, 1 }
  0x22   : > { %v460_v61 = vadd.f32 1.0, %v444_v60  ;;  %s1711_s20 = smov [#allocation4]  }
  0x23   : > { %s1240_s21 = sshll.u32 %s1711_s20, 4  ;;  %s1241_s21 = int_to_ptr.vmem [resolvable:$true] %s1240_s21 }
  0x24   : > { %s1583_s22 = scalar_lea.vmem %s1241_s21, 16  ;;  %s1589_s23 = scalar_lea.vmem %s1241_s21, 32 }
  0x25   : > { %487 = vmax.xlane.f32.xlu1 %v486_v16  ;;  %484 = vmax.xlane.f32.xlu0 %v483_v17  ;;  %p1584_p7 = scmp.ne.s32.totalorder %s1241_s21, %s1583_s22  ;;  %p1590_p10 = scmp.lt.s32.totalorder %s1241_s21, %s1241_s21 }
  0x26   : > { %p1591_p11 = scmp.lt.s32.totalorder %s1589_s23, %s1583_s22 }
  0x27   : > { %p1585_p8 = pnand %p1584_p7, %p1406_p6 }
  0x28   : > { %p1592_p12 = por %p1591_p11, %p1590_p10 }
  0x29   : > { %493 = vmax.xlane.f32.xlu1 %v492_v20  ;;  %490 = vmax.xlane.f32.xlu0 %v489_v21  ;;  %p1586_p9 = pneg %p1585_p8 }
  0x2b   : > { %p1593_p13 = pnand %p1592_p12, %p1586_p9 }
  0x2d   : > { %499 = vmax.xlane.f32.xlu1 %v498_v24  ;;  %496 = vmax.xlane.f32.xlu0 %v495_v25 }
  0x31   : > { %505 = vmax.xlane.f32.xlu1 %v504_v28  ;;  %502 = vmax.xlane.f32.xlu0 %v501_v29 }
  0x35   : > { %511 = vmax.xlane.f32.xlu1 %v510_v32  ;;  %508 = vmax.xlane.f32.xlu0 %v507_v33 }
  0x46   : > { %680 = vperm.xlu1 %1431, %v449_v35  }
  0x4a   : > { %685 = vperm.xlu1 %1431, %v450_v38  }
  0x4b   : > { %675 = vperm.xlu0 %1430, %v448_v40  }
  0x4e   : > { %690 = vperm.xlu1 %1431, %v451_v41  }
  0x52   : > { %695 = vperm.xlu1 %1431, %v452_v43  }
  0x56   : > { %700 = vperm.xlu1 %1431, %v453_v45  }
  0x5a   : > { %705 = vperm.xlu1 %1431, %v454_v47  }
  0x5e   : > { %710 = vperm.xlu1 %1431, %v455_v49  }
  0x62   : > { %715 = vperm.xlu1 %1431, %v456_v51  }
  0x66   : > { %720 = vperm.xlu1 %1431, %v457_v53   ;;  %v446_v53 = vld [vmem:[%s1786_s18 + $0x70] sm:$0xff] }
  0x6a   : > { %725 = vperm.xlu1 %1431, %v458_v56   ;;  %330 = vmax.xlane.f32.xlu0 %v329_v58 }
  0x6e   : > { %730 = vperm.xlu1 %1431, %v459_v59   ;;  %v462_v59 = vadd.f32 1.0, %v446_v53 }
  0x72   : > { %735 = vperm.xlu1 %1431, %v460_v61  }
  0x76   : > { %740 = vperm.xlu1 %1431, %v461_v63  }
  0xa6   : > { %v1888_v0 = vpop.xlane.xlu0 %466  ;;  %v1890_v4 = vpop.xlane.xlu1 %472 }
  0xa7   : > { %v513_v5 = vsub.f32 %v1790_v1, %v1888_v0  ;;  %v515_v7 = vsub.f32 %v1793_v2, %v1890_v4 }
  0xa9   : > { %v529_v8 = vmul.f32 1.442695, %v513_v5  ;;  %v533_v9 = vmul.f32 1.442695, %v515_v7 }
  0xaa   : > { %v1896_v12 = vpop.xlane.xlu0 %469  ;;  %v1898_v13 = vpop.xlane.xlu1 %475 }
  0xab   : > { %1432 = vpow2.f32 %v529_v8  ;;  %v514_v16 = vsub.f32 %v1796_v3, %v1896_v12  ;;  %v516_v17 = vsub.f32 %v1803_v6, %v1898_v13 }
  0xac   : > { %1434 = vpow2.f32 %v533_v9 }
  0xad   : > { %v531_v20 = vmul.f32 1.442695, %v514_v16  ;;  %v535_v25 = vmul.f32 1.442695, %v516_v17 }
  0xae   : > { %v1904_v21 = vpop.xlane.xlu1 %481  ;;  %v1906_v24 = vpop.xlane.xlu0 %478 }
  0xaf   : > { %1436 = vpow2.f32 %v531_v20  ;;  %v517_v28 = vsub.f32 %v1813_v11, %v1906_v24  ;;  %v518_v32 = vsub.f32 %v1810_v10, %v1904_v21 }
  0xb0   : > { %1438 = vpow2.f32 %v535_v25 }
  0xb1   : > { %v537_v33 = vmul.f32 1.442695, %v517_v28  ;;  %v539_v38 = vmul.f32 1.442695, %v518_v32 }
  0xb2   : > { %v1910_v29 = vpop.xlane.xlu1 %487  ;;  %v1914_v34 = vpop.xlane.xlu0 %484 }
  0xb3   : > { %1440 = vpow2.f32 %v537_v33  ;;  %v519_v39 = vsub.f32 %v1823_v15, %v1914_v34  ;;  %v520_v43 = vsub.f32 %v1820_v14, %v1910_v29 }
  0xb4   : > { %1442 = vpow2.f32 %v539_v38 }
  0xb5   : > { %v1433_v35 = vpop.eup %1432  ;;  %v541_v44 = vmul.f32 1.442695, %v519_v39  ;;  %v543_v49 = vmul.f32 1.442695, %v520_v43 }
  0xb6   : > { %v561_v36 = vsel %vm464_vm1, %v1433_v35, 0.0  ;;  %v1917_v37 = vpop.xlane.xlu1 %493  ;;  %v1435_v40 = vpop.eup %1434 }
  0xb7   : > { %562 = vadd.xlane.f32.xlu1 %v561_v36  ;;  %v567_v46 = vsel %vm464_vm1, %v1435_v40, 0.0  ;;  %v1927_v47 = vpop.xlane.xlu0 %490  ;;  %1444 = vpow2.f32 %v541_v44  ;;  %v522_v56 = vsub.f32 %v1830_v18, %v1917_v37 }
  0xb8   : > { %v521_v50 = vsub.f32 %v1833_v19, %v1927_v47  ;;  %1446 = vpow2.f32 %v543_v49 }
  0xb9   : > { %v1437_v41 = vpop.eup %1436  ;;  %v547_v62 = vmul.f32 1.442695, %v522_v56 }
  0xba   : > { %v564_v42 = vsel %vm464_vm1, %v1437_v41, 0.0  ;;  %v1924_v45 = vpop.xlane.xlu1 %499  ;;  %v1439_v48 = vpop.eup %1438  ;;  %v545_v57 = vmul.f32 1.442695, %v521_v50 }
  0xbb   : > { %565 = vadd.xlane.f32.xlu0 %v564_v42  ;;  %v570_v51 = vsel %vm464_vm1, %v1439_v48, 0.0  ;;  %v1938_v60 = vpop.xlane.xlu0 %496  ;;  %v524_v9 = vsub.f32 %v1840_v22, %v1924_v45 }
  0xbc   : > { %1448 = vpow2.f32 %v545_v57  ;;  %v523_v63 = vsub.f32 %v1843_v23, %v1938_v60 }
  0xbd   : > { %v1441_v52 = vpop.eup %1440  ;;  %1450 = vpow2.f32 %v547_v62  ;;  %v551_v28 = vmul.f32 1.442695, %v524_v9 }
  0xbe   : > { %v1933_v54 = vpop.xlane.xlu1 %505  ;;  %v573_v58 = vsel %vm464_vm1, %v1441_v52, 0.0  ;;  %v1443_v61 = vpop.eup %1442  ;;  %v549_v16 = vmul.f32 1.442695, %v523_v63 }
  0xbf   : > { %568 = vadd.xlane.f32.xlu0 %v567_v46  ;;  %v576_v7 = vsel %vm464_vm1, %v1443_v61, 0.0  ;;  %v1948_v32 = vpop.xlane.xlu0 %502 }
  0xc0   : > { %1452 = vpow2.f32 %v549_v16  ;;  %v525_v39 = vsub.f32 %v1853_v27, %v1948_v32 }
  0xc1   : > { %v1445_v8 = vpop.eup %1444  ;;  %1454 = vpow2.f32 %v551_v28 }
  0xc2   : > { %v1942_v5 = vpop.xlane.xlu1 %511  ;;  %v579_v17 = vsel %vm464_vm1, %v1445_v8, 0.0  ;;  %v1447_v20 = vpop.eup %1446  ;;  %v553_v42 = vmul.f32 1.442695, %v525_v39 }
  0xc3   : > { %571 = vadd.xlane.f32.xlu0 %v570_v51  ;;  %v582_v33 = vsel %vm464_vm1, %v1447_v20, 0.0  ;;  %v1954_v41 = vpop.xlane.xlu0 %508  ;;  %v528_v49 = vsub.f32 %v1860_v30, %v1942_v5 }
  0xc4   : > { %v527_v44 = vsub.f32 %v1863_v31, %v1954_v41  ;;  %1456 = vpow2.f32 %v553_v42 }
  0xc5   : > { %v559_v53 = vmul.f32 1.442695, %v528_v49 }
  0xc6   : > { %v681_v25 = vpop.permute.xlu1 %680  ;;  %v1449_v35 = vpop.eup %1448  ;;  %v557_v50 = vmul.f32 1.442695, %v527_v44 }
  0xc7   : > { %574 = vadd.xlane.f32.xlu0 %v573_v58  ;;  %v585_v38 = vsel %vm464_vm1, %v1449_v35, 0.0  ;;  %v1451_v40 = vpop.eup %1450  ;;  %v2421_v58 = vlaneseq }
  0xc8   : > { %745 = vperm.xlu1 %1431, %v462_v59   ;;  %v588_v43 = vsel %vm464_vm1, %v1451_v40, 0.0  ;;  %1458 = vpow2.f32 %v557_v50 }
  0xc9   : > { %1460 = vpow2.f32 %v559_v53  ;;  %v342_v62 = vand.u32 127, %v2421_v58 }
  0xca   : > { %v686_v36 = vpop.permute.xlu1 %685  ;;  %v1453_v46 = vpop.eup %1452 }
  0xcb   : > { %577 = vadd.xlane.f32.xlu0 %v576_v7  ;;  %v591_v51 = vsel %vm464_vm1, %v1453_v46, 0.0  ;;  %v1455_v52 = vpop.eup %1454  ;;  %v676_v8 = vpop.permute.xlu0 %675  ;;  %v1966_v16 = vcvt.s32.f32 %v342_v62 }
  0xcc   : > { %v594_v57 = vsel %vm464_vm1, %v1455_v52, 0.0 }
  0xcd   : > { %v754_v39 = vsub.f32 %v1966_v16, %v681_v25  ;;  %vm785_vm3 = vcmp.eq.f32.partialorder %v1966_v16, 32.0  ;;  %v755_v50 = vsub.f32 %v1966_v16, %v686_v36  ;;  %v526_v25 = vsub.f32 %v1850_v26, %v1933_v54 }
  0xce   : > { %v691_v48 = vpop.permute.xlu1 %690  ;;  %v1457_v31 = vpop.eup %1456 }
  0xcf   : > { %580 = vadd.xlane.f32.xlu0 %v579_v17  ;;  %v597_v61 = vsel %vm464_vm1, %v1457_v31, 0.0  ;;  %v753_v17 = vsub.f32 %v1966_v16, %v676_v8  ;;  %v756_v44 = vsub.f32 %v1966_v16, %v691_v48  ;;  %v1981_v31 = vld [vmem:[%s1776_s11] sm:$0xff] }
  0xd1   : > { %v769_v35 = vand.u32 2147483647, %v753_v17  ;;  %v772_v53 = vand.u32 2147483647, %v756_v44 }
  0xd2   : > { %v696_v56 = vpop.permute.xlu1 %695  ;;  %v1459_v30 = vpop.eup %1458 }
  0xd3   : > { %583 = vadd.xlane.f32.xlu0 %v582_v33  ;;  %v603_v7 = vsel %vm464_vm1, %v1459_v30, 0.0  ;;  %v1461_v9 = vpop.eup %1460  ;;  %v447_v33 = vld [vmem:[%s1786_s18 + $0x78] sm:$0xff]  ;;  %v786_v42 = vmax.f32 %v769_v35, 3.0  ;;  %v789_v62 = vmax.f32 %v772_v53, 3.0 }
  0xd4   : > { %v606_v20 = vsel %vm464_vm1, %v1461_v9, 0.0  ;;  %v555_v9 = vmul.f32 1.442695, %v526_v25 }
  0xd5   : > { %v802_v46 = vsel %vm785_vm3, %v786_v42, %v769_v35 }
  0xd6   : > { %v701_v59 = vpop.permute.xlu1 %700  ;;  %vm818_vm4 = vcmp.le.f32.partialorder %v802_v46, 3.0 }
  0xd7   : > { %586 = vadd.xlane.f32.xlu0 %v585_v38  ;;  %v463_v38 = vadd.f32 1.0, %v447_v33 }
  0xda   : > { %v706_v63 = vpop.permute.xlu1 %705 }
  0xdb   : > { %589 = vadd.xlane.f32.xlu0 %v588_v43  ;;  %v770_v43 = vand.u32 2147483647, %v754_v39  ;;  %v759_v35 = vsub.f32 %v1966_v16, %v706_v63 }
  0xdd   : > { %v787_v52 = vmax.f32 %v770_v43, 3.0 }
  0xde   : > { %v711_v28 = vpop.permute.xlu1 %710 }
  0xdf   : > { %592 = vadd.xlane.f32.xlu0 %v591_v51  ;;  %v834_v51 = vmul.f32 -2.0, %v802_v46  ;;  %v1986_v36 = vsel %vm785_vm3, %v787_v52, %v770_v43  ;;  %v760_v63 = vsub.f32 %v1966_v16, %v711_v28 }
  0xe0   : > { %v835_v26 = vmul.f32 -2.0, %v1986_v36  ;;  %vm819_vm5 = vcmp.le.f32.partialorder %v1986_v36, 3.0 }
  0xe1   : > { %v850_v30 = vmul.f32 1.442695, %v834_v51  ;;  %v775_v51 = vand.u32 2147483647, %v759_v35 }
  0xe2   : > { %v716_v40 = vpop.permute.xlu1 %715 }
  0xe3   : > { %595 = vadd.xlane.f32.xlu0 %v594_v57  ;;  %v757_v57 = vsub.f32 %v1966_v16, %v696_v56  ;;  %v761_v17 = vsub.f32 %v1966_v16, %v716_v40  ;;  %1462 = vpow2.f32 %v850_v30  ;;  %v852_v40 = vmul.f32 1.442695, %v835_v26 }
  0xe4   : > { %1464 = vpow2.f32 %v555_v9 }
  0xe5   : > { %v773_v48 = vand.u32 2147483647, %v757_v57  ;;  %1466 = vpow2.f32 %v852_v40 }
  0xe6   : > { %v721_v49 = vpop.permute.xlu1 %720 }
  0xe7   : > { %v762_v39 = vsub.f32 %v1966_v16, %v721_v49 }
  0xe9   : > { %v778_v57 = vand.u32 2147483647, %v762_v39 }
  0xea   : > { %v726_v8 = vpop.permute.xlu1 %725 }
  0xeb   : > { %v763_v49 = vsub.f32 %v1966_v16, %v726_v8 }
  0xec   : > { %598 = vadd.xlane.f32.xlu1 %v597_v61  ;;  %v771_v61 = vand.u32 2147483647, %v755_v50 }
  0xee   : > { %v788_v56 = vmax.f32 %v771_v61, 3.0  ;;  %v731_v42 = vpop.permute.xlu1 %730 }
  0xef   : > { %v764_v26 = vsub.f32 %v1966_v16, %v731_v42 }
  0xf0   : > { %604 = vadd.xlane.f32.xlu1 %v603_v7  ;;  %v758_v7 = vsub.f32 %v1966_v16, %v701_v59  ;;  %v1994_v59 = vsel %vm785_vm3, %v789_v62, %v772_v53  ;;  %v2000_v44 = vsel %vm785_vm3, %v788_v56, %v771_v61  ;;  %v792_v61 = vmax.f32 %v775_v51, 3.0 }
  0xf1   : > { %v837_v43 = vmul.f32 -2.0, %v1994_v59  ;;  %v836_v25 = vmul.f32 -2.0, %v2000_v44  ;;  %v779_v56 = vand.u32 2147483647, %v763_v49  ;;  %vm821_vm6 = vcmp.le.f32.partialorder %v1994_v59, 3.0 }
  0xf2   : > { %v774_v33 = vand.u32 2147483647, %v758_v7  ;;  %v776_v7 = vand.u32 2147483647, %v760_v63  ;;  %v736_v9 = vpop.permute.xlu1 %735  ;;  %v780_v63 = vand.u32 2147483647, %v764_v26 }
  0xf3   : > { %v856_v30 = vmul.f32 1.442695, %v837_v43  ;;  %v796_v42 = vmax.f32 %v779_v56, 3.0  ;;  %vm820_vm7 = vcmp.le.f32.partialorder %v2000_v44, 3.0 }
  0xf4   : > { %607 = vadd.xlane.f32.xlu1 %v606_v20  ;;  %v790_v20 = vmax.f32 %v773_v48, 3.0  ;;  %v791_v50 = vmax.f32 %v774_v33, 3.0  ;;  %v793_v46 = vmax.f32 %v776_v7, 3.0 }
  0xf5   : > { %1468 = vpow2.f32 %v856_v30 }
  0xf6   : > { %v2005_v52 = vsel %vm785_vm3, %v790_v20, %v773_v48  ;;  %v2012_v28 = vsel %vm785_vm3, %v791_v50, %v774_v33  ;;  %v1463_v48 = vpop.eup %1462  ;;  %v854_v20 = vmul.f32 1.442695, %v836_v25  ;;  %v2025_v50 = vsel %vm785_vm3, %v792_v61, %v775_v51  ;;  %v741_v49 = vpop.permute.xlu1 %740 }
  0xf7   : > { %v838_v62 = vmul.f32 -2.0, %v2005_v52  ;;  %v1465_v35 = vpop.eup %1464  ;;  %v839_v40 = vmul.f32 -2.0, %v2012_v28  ;;  %v2020_v43 = vsel %vm818_vm4, %v1463_v48, 0.0  ;;  %vm822_vm8 = vcmp.le.f32.partialorder %v2005_v52, 3.0 }
  0xf8   : > { %v600_v25 = vsel %vm464_vm1, %v1465_v35, 0.0  ;;  %1470 = vpow2.f32 %v854_v20  ;;  %v898_v51 = vsel %vm464_vm1, %v2020_v43, 0.0  ;;  %v1467_v48 = vpop.eup %1466  ;;  %v766_v20 = vsub.f32 %v1966_v16, %v741_v49 }
  0xf9   : > { %750 = vperm.xlu0 %1430, %v463_v38   ;;  %v777_v38 = vand.u32 2147483647, %v761_v17  ;;  %v795_v17 = vmax.f32 %v778_v57, 3.0  ;;  %v858_v39 = vmul.f32 1.442695, %v838_v62  ;;  %v840_v62 = vmul.f32 -2.0, %v2025_v50 }
  0xfa   : > { %v860_v30 = vmul.f32 1.442695, %v839_v40  ;;  %v2045_v35 = vsel %vm785_vm3, %v796_v42, %v779_v56  ;;  %v782_v49 = vand.u32 2147483647, %v766_v20  ;;  %vm823_vm9 = vcmp.le.f32.partialorder %v2012_v28, 3.0 }
  0xfb   : > { %v794_v53 = vmax.f32 %v777_v38, 3.0  ;;  %1472 = vpow2.f32 %v858_v39  ;;  %v862_v39 = vmul.f32 1.442695, %v840_v62  ;;  %vm824_vm11 = vcmp.le.f32.partialorder %v2025_v50, 3.0 }
  0xfc   : > { %1474 = vpow2.f32 %v860_v30  ;;  %vm828_vm14 = vcmp.le.f32.partialorder %v2045_v35, 3.0 }
  0xfd   : > { %v2017_v8 = vsel %vm785_vm3, %v794_v53, %v777_v38  ;;  %v765_v38 = vsub.f32 %v1966_v16, %v736_v9  ;;  %v2030_v53 = vsel %vm785_vm3, %v795_v17, %v778_v57  ;;  %v2040_v57 = vsel %vm785_vm3, %v793_v46, %v776_v7 }
  0xfe   : > { %v842_v33 = vmul.f32 -2.0, %v2017_v8  ;;  %v843_v9 = vmul.f32 -2.0, %v2030_v53  ;;  %v797_v17 = vmax.f32 %v780_v63, 3.0  ;;  %v841_v40 = vmul.f32 -2.0, %v2040_v57 }
  0xff   : > { %v781_v26 = vand.u32 2147483647, %v765_v38  ;;  %v844_v46 = vmul.f32 -2.0, %v2045_v35  ;;  %v1469_v38 = vpop.eup %1468  ;;  %vm826_vm10 = vcmp.le.f32.partialorder %v2017_v8, 3.0  ;;  %vm827_vm12 = vcmp.le.f32.partialorder %v2030_v53, 3.0  ;;  %v2087_v8 = vpop.xlane.xlu0 %330 }
 0x100   : > { %v866_v61 = vmul.f32 1.442695, %v842_v33  ;;  %v2050_v33 = vsel %vm819_vm5, %v1467_v48, 0.0  ;;  %v868_v7 = vmul.f32 1.442695, %v843_v9  ;;  %v2056_v56 = vsel %vm785_vm3, %v797_v17, %v780_v63 }
 0x101   : > { %v901_v42 = vsel %vm464_vm1, %v2050_v33, 0.0  ;;  %v864_v36 = vmul.f32 1.442695, %v841_v40  ;;  %v2061_v62 = vsel %vm821_vm6, %v1469_v38, 0.0  ;;  %v799_v9 = vmax.f32 %v782_v49, 3.0 }
 0x102   : > { %1476 = vpow2.f32 %v866_v61  ;;  %v1471_v30 = vpop.eup %1470  ;;  %v845_v61 = vmul.f32 -2.0, %v2056_v56  ;;  %v907_v44 = vsel %vm464_vm1, %v2061_v62, 0.0  ;;  %vm825_vm13 = vcmp.le.f32.partialorder %v2040_v57, 3.0 }
 0x103   : > { %1478 = vpow2.f32 %v862_v39  ;;  %v2069_v48 = vsel %vm820_vm7, %v1471_v30, 0.0  ;;  %v815_v52 = vsel %vm785_vm3, %v799_v9, %v782_v49  ;;  %v332_v50 = vsub.f32 %v1881_v55, %v2087_v8 }
 0x104   : > { %1480 = vpow2.f32 %v868_v7  ;;  %v872_v20 = vmul.f32 1.442695, %v845_v61  ;;  %vm829_vm15 = vcmp.le.f32.partialorder %v2056_v56, 3.0  ;;  %vm831_vm4 = vcmp.le.f32.partialorder %v815_v52, 3.0 }
 0x105   : > { %346 = vperm.xlu1 %1431, %v1981_v31   ;;  %v1473_v59 = vpop.eup %1472  ;;  %1482 = vpow2.f32 %v864_v36 }
 0x106   : > { %v2071_v17 = vsel %vm822_vm8, %v1473_v59, 0.0  ;;  %v1475_v40 = vpop.eup %1474 }
 0x107   : > { %v2081_v38 = vsel %vm823_vm9, %v1475_v40, 0.0 }
 0x108   : > { %v913_v30 = vsel %vm464_vm1, %v2081_v38, 0.0 }
 0x10c   : > { %v1477_v7 = vpop.eup %1476 }
 0x10d   : > { %v1479_v36 = vpop.eup %1478  ;;  %v2083_v28 = vsel %vm826_vm10, %v1477_v7, 0.0  ;;  %v333_v7 = vmul.f32 1.442695, %v332_v50 }
 0x10e   : > { %v1481_v49 = vpop.eup %1480  ;;  %v2093_v61 = vsel %vm824_vm11, %v1479_v36, 0.0 }
 0x10f   : > { %v1483_v9 = vpop.eup %1482 }
 0x110   : > { %v2105_v40 = vsel %vm825_vm13, %v1483_v9, 0.0 }
 0x111   : > { %v919_v35 = vsel %vm464_vm1, %v2105_v40, 0.0 }
 0x118   : > { %601 = vadd.xlane.f32.xlu0 %v600_v25  ;;  %v798_v25 = vmax.f32 %v781_v26, 3.0 }
 0x11a   : > { %v814_v63 = vsel %vm785_vm3, %v798_v25, %v781_v26  ;;  %v910_v26 = vsel %vm464_vm1, %v2071_v17, 0.0 }
 0x11b   : > { %v846_v39 = vmul.f32 -2.0, %v814_v63  ;;  %vm830_vm0 = vcmp.le.f32.partialorder %v814_v63, 3.0 }
 0x11c   : > { %899 = vadd.xlane.f32.xlu0 %v898_v51  ;;  %v870_v51 = vmul.f32 1.442695, %v844_v46  ;;  %v904_v46 = vsel %vm464_vm1, %v2069_v48, 0.0 }
 0x11d   : > { %v874_v25 = vmul.f32 1.442695, %v846_v39 }
 0x11e   : > { %1484 = vpow2.f32 %v870_v51  ;;  %v922_v51 = vsel %vm464_vm1, %v2083_v28, 0.0 }
 0x11f   : > { %1486 = vpow2.f32 %v872_v20  ;;  %v916_v20 = vsel %vm464_vm1, %v2093_v61, 0.0 }
 0x120   : > { %902 = vadd.xlane.f32.xlu0 %v901_v42  ;;  %v847_v42 = vmul.f32 -2.0, %v815_v52  ;;  %1488 = vpow2.f32 %v874_v25 }
 0x122   : > { %v876_v59 = vmul.f32 1.442695, %v847_v42 }
 0x124   : > { %908 = vadd.xlane.f32.xlu0 %v907_v44  ;;  %v2095_v44 = vsel %vm827_vm12, %v1481_v49, 0.0  ;;  %1490 = vpow2.f32 %v876_v59 }
 0x125   : > { %v925_v39 = vsel %vm464_vm1, %v2095_v44, 0.0  ;;  %1492 = vpow2.f32 %v333_v7 }
 0x128   : > { %911 = vadd.xlane.f32.xlu0 %v910_v26  ;;  %v1485_v53 = vpop.eup %1484 }
 0x129   : > { %905 = vadd.xlane.f32.xlu1 %v904_v46  ;;  %v2107_v26 = vsel %vm828_vm14, %v1485_v53, 0.0  ;;  %v1487_v57 = vpop.eup %1486  ;;  %vm356_vm14 = vcmp.gt.f32.partialorder %v1981_v31, 0.0 }
 0x12a   : > { %v928_v46 = vsel %vm464_vm1, %v2107_v26, 0.0  ;;  %v2114_v25 = vsel %vm829_vm15, %v1487_v57, 0.0  ;;  %v1489_v42 = vpop.eup %1488 }
 0x12b   : > { %v931_v36 = vsel %vm464_vm1, %v2114_v25, 0.0  ;;  %v2118_v49 = vsel %vm830_vm0, %v1489_v42, 0.0 }
 0x12c   : > { %914 = vadd.xlane.f32.xlu0 %v913_v30  ;;  %v934_v30 = vsel %vm464_vm1, %v2118_v49, 0.0 }
 0x12d   : > { %923 = vadd.xlane.f32.xlu1 %v922_v51 }
 0x12e   : > { %v1491_v56 = vpop.eup %1490 }
 0x12f   : > { %v2122_v51 = vsel %vm831_vm4, %v1491_v56, 0.0  ;;  %v1493_v59 = vpop.eup %1492 }
 0x130   : > { %917 = vadd.xlane.f32.xlu0 %v916_v20  ;;  %v937_v9 = vsel %vm464_vm1, %v2122_v51, 0.0  ;;  %v335_v63 = vsel %vm328_vm2, %v1493_v59, 0.0 }
 0x131   : > { %926 = vadd.xlane.f32.xlu1 %v925_v39 }
 0x134   : > { %920 = vadd.xlane.f32.xlu0 %v919_v35 }
 0x135   : > { %929 = vadd.xlane.f32.xlu1 %v928_v46 }
 0x139   : > { %932 = vadd.xlane.f32.xlu1 %v931_v36 }
 0x13d   : > { %935 = vadd.xlane.f32.xlu1 %v934_v30 }
 0x141   : > { %938 = vadd.xlane.f32.xlu1 %v937_v9 }
 0x144   : > { %v563_v50 = vpop.xlane.xlu1 %562 }
 0x145   : > { %336 = vadd.xlane.f32.xlu1 %v335_v63  ;;  %1494 = vlog2.f32 %v563_v50 }
 0x148   : > { %v746_v53 = vpop.permute.xlu1 %745  ;;  %v566_v20 = vpop.xlane.xlu0 %565 }
 0x149   : > { %v767_v52 = vsub.f32 %v1966_v16, %v746_v53  ;;  %1496 = vlog2.f32 %v566_v20 }
 0x14b   : > { %v783_v39 = vand.u32 2147483647, %v767_v52 }
 0x14c   : > { %v569_v7 = vpop.xlane.xlu0 %568 }
 0x14d   : > { %v800_v57 = vmax.f32 %v783_v39, 3.0  ;;  %1498 = vlog2.f32 %v569_v7 }
 0x14f   : > { %v816_v35 = vsel %vm785_vm3, %v800_v57, %v783_v39  ;;  %v1495_v36 = vpop.eup %1494 }
 0x150   : > { %v572_v46 = vpop.xlane.xlu0 %571  ;;  %v848_v42 = vmul.f32 -2.0, %v816_v35  ;;  %v610_v30 = vmul.f32 0.6931472, %v1495_v36  ;;  %vm832_vm5 = vcmp.le.f32.partialorder %v816_v35, 3.0 }
 0x151   : > { %1500 = vlog2.f32 %v572_v46 }
 0x152   : > { %v878_v56 = vmul.f32 1.442695, %v848_v42  ;;  %v641_v50 = vadd.f32 %v610_v30, %v1888_v0 }
 0x153   : > { %v1497_v9 = vpop.eup %1496 }
 0x154   : > { %v575_v59 = vpop.xlane.xlu0 %574  ;;  %1502 = vpow2.f32 %v878_v56  ;;  %v612_v53 = vmul.f32 0.6931472, %v1497_v9  ;;  %v657_v57 = vsub.f32 %v1790_v1, %v641_v50 }
 0x155   : > { %1504 = vlog2.f32 %v575_v59 }
 0x156   : > { %v642_v7 = vadd.f32 %v612_v53, %v1896_v12  ;;  %v946_v30 = vmul.f32 %v2020_v43, %v657_v57 }
 0x157   : > { %v1499_v63 = vpop.eup %1498 }
 0x158   : > { %v578_v20 = vpop.xlane.xlu0 %577  ;;  %v614_v52 = vmul.f32 0.6931472, %v1499_v63  ;;  %v658_v12 = vsub.f32 %v1796_v3, %v642_v7  ;;  %v962_v50 = vsel %vm464_vm1, %v946_v30, 0.0 }
 0x159   : > { %1506 = vlog2.f32 %v578_v20 }
 0x15a   : > { %v643_v46 = vadd.f32 %v614_v52, %v1890_v4 }
 0x15b   : > { %v1501_v58 = vpop.eup %1500 }
 0x15c   : > { %v581_v39 = vpop.xlane.xlu0 %580  ;;  %v616_v56 = vmul.f32 0.6931472, %v1501_v58  ;;  %v659_v1 = vsub.f32 %v1793_v2, %v643_v46  ;;  %v947_v58 = vmul.f32 %v2050_v33, %v658_v12 }
 0x15d   : > { %1508 = vlog2.f32 %v581_v39 }
 0x15e   : > { %v1503_v42 = vpop.eup %1502  ;;  %v644_v35 = vadd.f32 %v616_v56, %v1898_v13  ;;  %v948_v43 = vmul.f32 %v2069_v48, %v659_v1  ;;  %v965_v7 = vsel %vm464_vm1, %v947_v58, 0.0 }
 0x15f   : > { %v2134_v36 = vsel %vm832_vm5, %v1503_v42, 0.0  ;;  %v1505_v9 = vpop.eup %1504 }
 0x160   : > { %v584_v59 = vpop.xlane.xlu0 %583  ;;  %v940_v0 = vsel %vm464_vm1, %v2134_v36, 0.0  ;;  %v618_v4 = vmul.f32 0.6931472, %v1505_v9  ;;  %v660_v2 = vsub.f32 %v1803_v6, %v644_v35  ;;  %v968_v39 = vsel %vm464_vm1, %v948_v43, 0.0 }
 0x161   : > { %941 = vadd.xlane.f32.xlu0 %v940_v0  ;;  %1510 = vlog2.f32 %v584_v59 }
 0x162   : > { %v645_v3 = vadd.f32 %v618_v4, %v1906_v24  ;;  %v949_v48 = vmul.f32 %v2061_v62, %v660_v2 }
 0x163   : > { %v1507_v53 = vpop.eup %1506 }
 0x164   : > { %v587_v63 = vpop.xlane.xlu0 %586  ;;  %v620_v20 = vmul.f32 0.6931472, %v1507_v53  ;;  %v661_v24 = vsub.f32 %v1813_v11, %v645_v3  ;;  %v971_v30 = vsel %vm464_vm1, %v949_v48, 0.0 }
 0x165   : > { %963 = vadd.xlane.f32.xlu0 %v962_v50  ;;  %1512 = vlog2.f32 %v587_v63 }
 0x166   : > { %v646_v33 = vadd.f32 %v620_v20, %v1904_v21  ;;  %v950_v12 = vmul.f32 %v2071_v17, %v661_v24 }
 0x167   : > { %v1509_v13 = vpop.eup %1508 }
 0x168   : > { %v590_v52 = vpop.xlane.xlu0 %589  ;;  %v622_v42 = vmul.f32 0.6931472, %v1509_v13  ;;  %v662_v9 = vsub.f32 %v1810_v10, %v646_v33  ;;  %v974_v11 = vsel %vm464_vm1, %v950_v12, 0.0 }
 0x169   : > { %966 = vadd.xlane.f32.xlu0 %v965_v7  ;;  %1514 = vlog2.f32 %v590_v52 }
 0x16a   : > { %v647_v6 = vadd.f32 %v622_v42, %v1914_v34  ;;  %v951_v1 = vmul.f32 %v2081_v38, %v662_v9 }
 0x16b   : > { %v1511_v57 = vpop.eup %1510 }
 0x16c   : > { %v593_v46 = vpop.xlane.xlu0 %592  ;;  %v624_v56 = vmul.f32 0.6931472, %v1511_v57  ;;  %v663_v35 = vsub.f32 %v1823_v15, %v647_v6  ;;  %v977_v53 = vsel %vm464_vm1, %v951_v1, 0.0 }
 0x16d   : > { %1516 = vlog2.f32 %v593_v46  ;;  %969 = vadd.xlane.f32.xlu0 %v968_v39 }
 0x16e   : > { %v648_v21 = vadd.f32 %v624_v56, %v1910_v29  ;;  %v952_v29 = vmul.f32 %v2093_v61, %v663_v35 }
 0x16f   : > { %v1513_v59 = vpop.eup %1512 }
 0x170   : > { %v596_v0 = vpop.xlane.xlu0 %595  ;;  %v626_v62 = vmul.f32 0.6931472, %v1513_v59  ;;  %v664_v17 = vsub.f32 %v1820_v14, %v648_v21  ;;  %v980_v2 = vsel %vm464_vm1, %v952_v29, 0.0  ;;  %v1566_v29 = vld [vmem:[%s1781_s15 + $0x78] sm:$0xff] }
 0x171   : > { %1518 = vlog2.f32 %v596_v0  ;;  %972 = vadd.xlane.f32.xlu0 %v971_v30 }
 0x172   : > { %v649_v63 = vadd.f32 %v626_v62, %v1927_v47  ;;  %v953_v47 = vmul.f32 %v2105_v40, %v664_v17 }
 0x173   : > { %v1515_v4 = vpop.eup %1514 }
 0x174   : > { %v628_v50 = vmul.f32 0.6931472, %v1515_v4  ;;  %v665_v14 = vsub.f32 %v1833_v19, %v649_v63  ;;  %v983_v33 = vsel %vm464_vm1, %v953_v47, 0.0 }
 0x175   : > { %975 = vadd.xlane.f32.xlu0 %v974_v11  ;;  %v1564_v11 = vld [vmem:[%s1781_s15 + $0x70] sm:$0xff] }
 0x176   : > { %v650_v52 = vadd.f32 %v628_v50, %v1917_v37  ;;  %v954_v40 = vmul.f32 %v2083_v28, %v665_v14 }
 0x177   : > { %v1517_v34 = vpop.eup %1516 }
 0x178   : > { %v630_v10 = vmul.f32 0.6931472, %v1517_v34  ;;  %v751_v58 = vpop.permute.xlu0 %750  ;;  %v986_v24 = vsel %vm464_vm1, %v954_v40, 0.0 }
 0x179   : > { %v768_v43 = vsub.f32 %v1966_v16, %v751_v58  ;;  %v599_v3 = vpop.xlane.xlu1 %598  ;;  %978 = vadd.xlane.f32.xlu0 %v977_v53  ;;  %v1565_v58 = vld [vmem:[%s1781_s15 + $0x68] sm:$0xff] }
 0x17a   : > { %v651_v15 = vadd.f32 %v630_v10, %v1938_v60  ;;  %1520 = vlog2.f32 %v599_v3 }
 0x17b   : > { %v1519_v38 = vpop.eup %1518  ;;  %v784_v20 = vand.u32 2147483647, %v768_v43 }
 0x17c   : > { %v632_v7 = vmul.f32 0.6931472, %v1519_v38  ;;  %v667_v61 = vsub.f32 %v1843_v23, %v651_v15  ;;  %v666_v23 = vsub.f32 %v1830_v18, %v650_v52 }
 0x17d   : > { %v801_v13 = vmax.f32 %v784_v20, 3.0  ;;  %v605_v39 = vpop.xlane.xlu1 %604  ;;  %981 = vadd.xlane.f32.xlu0 %v980_v2  ;;  %v1709_v2 = vmov 1966171168  }
 0x17e   : > { %v652_v57 = vadd.f32 %v632_v7, %v1924_v45  ;;  %1522 = vlog2.f32 %v605_v39  ;;  %v956_v60 = vmul.f32 %v2107_v26, %v667_v61  ;;  %v955_v56 = vmul.f32 %v2095_v44, %v666_v23 }
 0x17f   : > { %v817_v19 = vsel %vm785_vm3, %v801_v13, %v784_v20  ;;  %v369_v61 = vunpack.c.l.s4 %v1709_v2  ;;  %v2422_v39 = vlaneseq }
 0x180   : > { %v992_v37 = vsel %vm464_vm1, %v956_v60, 0.0  ;;  %v668_v42 = vsub.f32 %v1840_v22, %v652_v57  ;;  %v849_v46 = vmul.f32 -2.0, %v817_v19  ;;  %v989_v6 = vsel %vm464_vm1, %v955_v56, 0.0 }
 0x181   : > { %984 = vadd.xlane.f32.xlu0 %v983_v33  ;;  %993 = vadd.xlane.f32.xlu1 %v992_v37  ;;  %v608_v12 = vpop.xlane.xlu1 %607  ;;  %vm833_vm3 = vcmp.le.f32.partialorder %v817_v19, 3.0  ;;  %v370_v13 = vunpack.c.0.s8 %v369_v61  ;;  %v372_v57 = vshrl.u32 %v2422_v39, 7 }
 0x182   : > { %v957_v45 = vmul.f32 %v2114_v25, %v668_v42  ;;  %v880_v48 = vmul.f32 1.442695, %v849_v46 }
 0x183   : > { %v2207_v40 = vsub.s32 %v370_v13, %v372_v57 }
 0x184   : > { %v1521_v26 = vpop.eup %1520  ;;  %v995_v28 = vsel %vm464_vm1, %v957_v45, 0.0  ;;  %1524 = vpow2.f32 %v880_v48 }
 0x185   : > { %v634_v59 = vmul.f32 0.6931472, %v1521_v26  ;;  %987 = vadd.xlane.f32.xlu0 %v986_v24  ;;  %996 = vadd.xlane.f32.xlu1 %v995_v28  ;;  %1526 = vlog2.f32 %v608_v12 }
 0x187   : > { %v653_v18 = vadd.f32 %v634_v59, %v1948_v32  ;;  %v347_v32 = vpop.permute.xlu1 %346 }
 0x188   : > { %v1523_v22 = vpop.eup %1522  ;;  %vm349_vm6 = vcmp.eq.f32.partialorder %v1966_v16, %v347_v32 }
 0x189   : > { %v638_v0 = vmul.f32 0.6931472, %v1523_v22  ;;  %990 = vadd.xlane.f32.xlu0 %v989_v6  ;;  %v669_v30 = vsub.f32 %v1853_v27, %v653_v18 }
 0x18b   : > { %v655_v25 = vadd.f32 %v638_v0, %v1954_v41  ;;  %v958_v62 = vmul.f32 %v2118_v49, %v669_v30  ;;  %v350_v41 = vsel %vm349_vm6, %v1881_v55, 0.0  ;;  %v1567_v0 = vld [vmem:[%s1786_s18] sm:$0xff] }
 0x18c   : > { %v351_v49 = vsel %vm328_vm2, %v350_v41, 0.0  ;;  %vm359_vm2 = vcmask 15368  }
 0x18d   : > { %v671_v1 = vsub.f32 %v1564_v11, %v655_v25  ;;  %v998_v35 = vsel %vm464_vm1, %v958_v62, 0.0 }
 0x18e   : > { %v1525_v9 = vpop.eup %1524 }
 0x18f   : > { %v897_v44 = vsel %vm833_vm3, %v1525_v9, 0.0  ;;  %v960_v4 = vmul.f32 %v2134_v36, %v671_v1  ;;  %v1527_v63 = vpop.eup %1526 }
 0x190   : > { %v943_v21 = vsel %vm464_vm1, %v897_v44, 0.0  ;;  %v640_v17 = vmul.f32 0.6931472, %v1527_v63 }
 0x191   : > { %944 = vadd.xlane.f32.xlu0 %v943_v21  ;;  %v1004_v27 = vsel %vm464_vm1, %v960_v4, 0.0 }
 0x192   : > { %v656_v36 = vadd.f32 %v640_v17, %v1942_v5  ;;  %v389_v5 = vsel %vm359_vm2, %v1981_v31, 0.0 }
 0x193   : > { %v390_v47 = vrot.slane %v389_v5, 4 }
 0x194   : > { %v672_v43 = vsub.f32 %v1566_v29, %v656_v36  ;;  %v1570_v29 = vld [vmem:[%s1786_s18 + $0x18] sm:$0xff] }
 0x195   : > { %999 = vadd.xlane.f32.xlu0 %v998_v35  ;;  %v391_v14 = vadd.f32 %v390_v47, %v389_v5  ;;  %vm1062_vm9 = vcmp.gt.f32.partialorder %v1570_v29, 0.0 }
 0x196   : > { %v961_v15 = vmul.f32 %v897_v44, %v672_v43  ;;  %v1568_v44 = vld [vmem:[%s1786_s18 + $0x8] sm:$0xff] }
 0x197   : > { %v392_v7 = vrot.slane %v391_v14, 2  ;;  %vm1060_vm7 = vcmp.gt.f32.partialorder %v1568_v44, 0.0 }
 0x198   : > { %v1007_v38 = vsel %vm464_vm1, %v961_v15, 0.0 }
 0x199   : > { %1005 = vadd.xlane.f32.xlu0 %v1004_v27  ;;  %v393_v60 = vadd.f32 %v392_v7, %v391_v14  ;;  %v1571_v14 = vld [vmem:[%s1786_s18 + $0x20] sm:$0xff] }
 0x19a   : > { %vm1063_vm10 = vcmp.gt.f32.partialorder %v1571_v14, 0.0 }
 0x19b   : > { %v394_v33 = vrot.slane %v393_v60, 1 }
 0x19d   : > { %352 = vadd.xlane.f32.xlu0 %v351_v49  ;;  %v395_v19 = vadd.f32 %v394_v33, %v393_v60  ;;  %v1166_v60 = vsel %vm359_vm2, %v1568_v44, 0.0  ;;  %v1165_v33 = vsel %vm359_vm2, %v1567_v0, 0.0 }
 0x19f   : > { %v403_v42 = vrot.slane %v395_v19, %v2207_v40 }
 0x1a1   : > { %v410_v23 = vrot.slane %v403_v42, %v2207_v40 }
 0x1a5   : > { %v602_v34 = vpop.xlane.xlu0 %601 }
 0x1a6   : > { %1528 = vlog2.f32 %v602_v34  ;;  %v1569_v34 = vld [vmem:[%s1786_s18 + $0x10] sm:$0xff] }
 0x1a7   : > { %vm1061_vm8 = vcmp.gt.f32.partialorder %v1569_v34, 0.0 }
 0x1a9   : > { %v900_v20 = vpop.xlane.xlu0 %899 }
 0x1aa   : > { %1530 = vrcp.f32 %v900_v20 }
 0x1b0   : > { %v1529_v50 = vpop.eup %1528 }
 0x1b1   : > { %v636_v10 = vmul.f32 0.6931472, %v1529_v50 }
 0x1b3   : > { %v654_v16 = vadd.f32 %v636_v10, %v1933_v54  ;;  %v903_v54 = vpop.xlane.xlu0 %902 }
 0x1b4   : > { %1532 = vrcp.f32 %v903_v54  ;;  %v1531_v59 = vpop.eup %1530 }
 0x1b5   : > { %v670_v53 = vsub.f32 %v1565_v58, %v654_v16 }
 0x1b6   : > { %v906_v48 = vpop.xlane.xlu1 %905 }
 0x1b7   : > { %v959_v55 = vmul.f32 %v2122_v51, %v670_v53  ;;  %v909_v52 = vpop.xlane.xlu0 %908  ;;  %1534 = vrcp.f32 %v906_v48 }
 0x1b8   : > { %1536 = vrcp.f32 %v909_v52 }
 0x1b9   : > { %v1001_v3 = vsel %vm464_vm1, %v959_v55, 0.0  ;;  %vm1059_vm1 = vcmp.gt.f32.partialorder %v1567_v0, 0.0 }
 0x1ba   : > { %1002 = vadd.xlane.f32.xlu1 %v1001_v3  ;;  %v2214_v24 = vpop.xlane.xlu1 %923 }
 0x1bb   : > { %v912_v51 = vpop.xlane.xlu0 %911 }
 0x1bc   : > { %1538 = vrcp.f32 %v912_v51 }
 0x1be   : > { %1008 = vadd.xlane.f32.xlu1 %v1007_v38  ;;  %v2216_v6 = vpop.xlane.xlu1 %926  ;;  %v1533_v12 = vpop.eup %1532 }
 0x1bf   : > { %v915_v37 = vpop.xlane.xlu0 %914 }
 0x1c0   : > { %1540 = vrcp.f32 %v915_v37  ;;  %v1572_v37 = vld [vmem:[%s1786_s18 + $0x28] sm:$0xff] }
 0x1c1   : > { %v1535_v32 = vpop.eup %1534  ;;  %vm1064_vm11 = vcmp.gt.f32.partialorder %v1572_v37, 0.0 }
 0x1c2   : > { %v2220_v35 = vpop.xlane.xlu1 %929  ;;  %v1537_v10 = vpop.eup %1536 }
 0x1c3   : > { %v918_v46 = vpop.xlane.xlu0 %917 }
 0x1c4   : > { %1542 = vrcp.f32 %v918_v46 }
 0x1c6   : > { %v2227_v55 = vpop.xlane.xlu1 %932  ;;  %v1539_v38 = vpop.eup %1538 }
 0x1c7   : > { %v921_v45 = vpop.xlane.xlu0 %920 }
 0x1c8   : > { %1544 = vrcp.f32 %v921_v45 }
 0x1ca   : > { %v1541_v51 = vpop.eup %1540  ;;  %v2231_v13 = vpop.xlane.xlu1 %935 }
 0x1ce   : > { %v1543_v48 = vpop.eup %1542 }
 0x1cf   : > { %411 = vrot.lane.b32.xlu1 %v410_v23, %s1710_s19 }
 0x1ee   : > { %v2212_v26 = vpop.xlane.xlu0 %941 }
 0x1f2   : > { %v964_v28 = vpop.xlane.xlu0 %963 }
 0x1f3   : > { %v1010_v56 = vsub.f32 0.0, %v964_v28  ;;  %v1167_v28 = vadd.f32 %v1166_v60, %v1165_v33 }
 0x1f5   : > { %v1027_v22 = vmul.f32 %v1531_v59, %v1010_v56 }
 0x1f6   : > { %v967_v18 = vpop.xlane.xlu0 %966 }
 0x1f7   : > { %v1075_v25 = vmul.f32 %v1567_v0, %v1027_v22  ;;  %v1011_v30 = vsub.f32 0.0, %v967_v18  ;;  %v1168_v22 = vsel %vm359_vm2, %v1569_v34, 0.0 }
 0x1f9   : > { %v1029_v9 = vmul.f32 %v1533_v12, %v1011_v30  ;;  %v1091_v62 = vsel %vm1059_vm1, %v1075_v25, 0.0  ;;  %v1573_v25 = vld [vmem:[%s1786_s18 + $0x30] sm:$0xff]  ;;  %v2240_v30 = vpop.xlane.xlu1 %938 }
 0x1fa   : > { %v970_v21 = vpop.xlane.xlu0 %969  ;;  %v1107_v41 = vsel %vm359_vm2, %v1091_v62, 0.0  ;;  %vm1065_vm12 = vcmp.gt.f32.partialorder %v1573_v25, 0.0  ;;  %v1169_v62 = vadd.f32 %v1168_v22, %v1167_v28 }
 0x1fb   : > { %v1076_v11 = vmul.f32 %v1568_v44, %v1029_v9  ;;  %v1012_v1 = vsub.f32 0.0, %v970_v21  ;;  %v1545_v21 = vpop.eup %1544 }
 0x1fd   : > { %v1092_v4 = vsel %vm1060_vm7, %v1076_v11, 0.0  ;;  %v1031_v27 = vmul.f32 %v1535_v32, %v1012_v1  ;;  %v1170_v32 = vsel %vm359_vm2, %v1570_v29, 0.0 }
 0x1fe   : > { %v1108_v49 = vsel %vm359_vm2, %v1092_v4, 0.0  ;;  %v973_v63 = vpop.xlane.xlu0 %972 }
 0x1ff   : > { %v1109_v17 = vadd.f32 %v1108_v49, %v1107_v41  ;;  %v1077_v50 = vmul.f32 %v1569_v34, %v1031_v27  ;;  %v1013_v36 = vsub.f32 0.0, %v973_v63  ;;  %v1574_v27 = vld [vmem:[%s1786_s18 + $0x38] sm:$0xff]  ;;  %v1171_v63 = vadd.f32 %v1170_v32, %v1169_v62 }
 0x200   : > { %vm1066_vm13 = vcmp.gt.f32.partialorder %v1574_v27, 0.0 }
 0x201   : > { %v1093_v16 = vsel %vm1061_vm8, %v1077_v50, 0.0  ;;  %v1033_v58 = vmul.f32 %v1537_v10, %v1013_v36  ;;  %v1172_v36 = vsel %vm359_vm2, %v1571_v14, 0.0  ;;  %vm386_vm8 = vcmask 0  }
 0x202   : > { %v1110_v53 = vsel %vm359_vm2, %v1093_v16, 0.0  ;;  %v976_v43 = vpop.xlane.xlu0 %975 }
 0x203   : > { %v1078_v3 = vmul.f32 %v1570_v29, %v1033_v58  ;;  %v1014_v15 = vsub.f32 0.0, %v976_v43  ;;  %v1111_v20 = vadd.f32 %v1110_v53, %v1109_v17  ;;  %v337_v17 = vpop.xlane.xlu1 %336  ;;  %v1173_v58 = vadd.f32 %v1172_v36, %v1171_v63 }
 0x204   : > { %1546 = vlog2.f32 %v337_v17  ;;  %v1174_v53 = vsel %vm359_vm2, %v1572_v37, 0.0 }
 0x205   : > { %v1094_v5 = vsel %vm1062_vm9, %v1078_v3, 0.0  ;;  %v1035_v47 = vmul.f32 %v1539_v38, %v1014_v15  ;;  %v1175_v43 = vadd.f32 %v1174_v53, %v1173_v58  ;;  %v1176_v3 = vsel %vm359_vm2, %v1573_v25, 0.0  ;;  %v1581_v53 = vld [vmem:[%s1786_s18 + $0x70] sm:$0xff] }
 0x206   : > { %v1112_v54 = vsel %vm359_vm2, %v1094_v5, 0.0  ;;  %v979_v52 = vpop.xlane.xlu0 %978  ;;  %v1178_v5 = vsel %vm359_vm2, %v1574_v27, 0.0  ;;  %1548 = vrcp.f32 %v2214_v24  ;;  %vm1073_vm6 = vcmp.gt.f32.partialorder %v1581_v53, 0.0 }
 0x207   : > { %v1113_v7 = vadd.f32 %v1112_v54, %v1111_v20  ;;  %v1079_v2 = vmul.f32 %v1571_v14, %v1035_v47  ;;  %v1015_v61 = vsub.f32 0.0, %v979_v52  ;;  %v1177_v38 = vadd.f32 %v1176_v3, %v1175_v43  ;;  %v1575_v52 = vld [vmem:[%s1786_s18 + $0x40] sm:$0xff] }
 0x208   : > { %1550 = vrcp.f32 %v2216_v6  ;;  %vm1067_vm15 = vcmp.gt.f32.partialorder %v1575_v52, 0.0 }
 0x209   : > { %v1095_v39 = vsel %vm1063_vm10, %v1079_v2, 0.0  ;;  %v1037_v57 = vmul.f32 %v1541_v51, %v1015_v61  ;;  %v1179_v54 = vadd.f32 %v1178_v5, %v1177_v38  ;;  %1552 = vrcp.f32 %v2220_v35  ;;  %v1579_v35 = vld [vmem:[%s1786_s18 + $0x60] sm:$0xff] }
 0x20a   : > { %v1114_v19 = vsel %vm359_vm2, %v1095_v39, 0.0  ;;  %v982_v42 = vpop.xlane.xlu0 %981  ;;  %v1576_v39 = vld [vmem:[%s1786_s18 + $0x48] sm:$0xff]  ;;  %1554 = vrcp.f32 %v2227_v55  ;;  %vm1071_vm3 = vcmp.gt.f32.partialorder %v1579_v35, 0.0 }
 0x20b   : > { %v1115_v23 = vadd.f32 %v1114_v19, %v1113_v7  ;;  %v1080_v46 = vmul.f32 %v1572_v37, %v1037_v57  ;;  %v1016_v45 = vsub.f32 0.0, %v982_v42  ;;  %v1180_v7 = vsel %vm359_vm2, %v1575_v52, 0.0  ;;  %v2268_v42 = vld [vmem:[%s1786_s18 + $0x50] sm:$0xff]  ;;  %v2284_v55 = vld [vmem:[%s1786_s18 + $0x68] sm:$0xff] }
 0x20c   : > { %v1181_v61 = vadd.f32 %v1180_v7, %v1179_v54  ;;  %v1182_v57 = vsel %vm359_vm2, %v1576_v39, 0.0  ;;  %v1184_v24 = vsel %vm359_vm2, %v2268_v42, 0.0  ;;  %1556 = vrcp.f32 %v2231_v13 }
 0x20d   : > { %v1096_v56 = vsel %vm1064_vm11, %v1080_v46, 0.0  ;;  %v1039_v59 = vmul.f32 %v1543_v48, %v1016_v45  ;;  %v2275_v48 = vld [vmem:[%s1786_s18 + $0x58] sm:$0xff]  ;;  %1558 = vrcp.f32 %v2212_v26  ;;  %vm1068_vm0 = vcmp.gt.f32.partialorder %v1576_v39, 0.0 }
 0x20e   : > { %v1116_v18 = vsel %vm359_vm2, %v1096_v56, 0.0  ;;  %v985_v0 = vpop.xlane.xlu0 %984  ;;  %v1547_v20 = vpop.eup %1546  ;;  %v1183_v19 = vadd.f32 %v1182_v57, %v1181_v61  ;;  %v1186_v28 = vsel %vm359_vm2, %v2275_v48, 0.0  ;;  %1560 = vrcp.f32 %v2240_v30 }
 0x20f   : > { %v1117_v12 = vadd.f32 %v1116_v18, %v1115_v23  ;;  %v1081_v9 = vmul.f32 %v1573_v25, %v1039_v59  ;;  %v1017_v44 = vsub.f32 0.0, %v985_v0  ;;  %v339_v14 = vmul.f32 0.6931472, %v1547_v20  ;;  %v994_v59 = vpop.xlane.xlu1 %993 }
 0x210   : > { %v1185_v45 = vadd.f32 %v1184_v24, %v1183_v19  ;;  %v1549_v56 = vpop.eup %1548  ;;  %v1020_v62 = vsub.f32 0.0, %v994_v59  ;;  %vm1069_vm4 = vcmp.gt.f32.partialorder %v2268_v42, 0.0  ;;  %vm1070_vm5 = vcmp.gt.f32.partialorder %v2275_v48, 0.0 }
 0x211   : > { %v1097_v11 = vsel %vm1065_vm12, %v1081_v9, 0.0  ;;  %v1041_v1 = vmul.f32 %v1545_v21, %v1017_v44  ;;  %v340_v51 = vadd.f32 %v339_v14, %v2087_v8  ;;  %v1188_v9 = vsel %vm359_vm2, %v1579_v35, 0.0 }
 0x212   : > { %v1118_v4 = vsel %vm359_vm2, %v1097_v11, 0.0  ;;  %v988_v34 = vpop.xlane.xlu0 %987  ;;  %v1551_v25 = vpop.eup %1550  ;;  %v1187_v0 = vadd.f32 %v1186_v28, %v1185_v45  ;;  %vm1072_vm1 = vcmp.gt.f32.partialorder %v2284_v55, 0.0 }
 0x213   : > { %v1119_v41 = vadd.f32 %v1118_v4, %v1117_v12  ;;  %v1082_v49 = vmul.f32 %v1574_v27, %v1041_v1  ;;  %v1018_v8 = vsub.f32 0.0, %v988_v34  ;;  %v997_v32 = vpop.xlane.xlu1 %996  ;;  %v1190_v27 = vsel %vm359_vm2, %v2284_v55, 0.0  ;;  %v1553_v13 = vpop.eup %1552 }
 0x214   : > { %v1189_v1 = vadd.f32 %v1188_v9, %v1187_v0  ;;  %v1047_v34 = vmul.f32 %v1553_v13, %v1020_v62  ;;  %v1021_v63 = vsub.f32 0.0, %v997_v32  ;;  %v1555_v58 = vpop.eup %1554 }
 0x215   : > { %v1098_v50 = vsel %vm1066_vm13, %v1082_v49, 0.0  ;;  %v1043_v18 = vmul.f32 %v1549_v56, %v1018_v8 }
 0x216   : > { %v1120_v10 = vsel %vm359_vm2, %v1098_v50, 0.0  ;;  %v991_v29 = vpop.xlane.xlu0 %990  ;;  %v1191_v36 = vadd.f32 %v1190_v27, %v1189_v1  ;;  %v1557_v3 = vpop.eup %1556  ;;  %v1085_v20 = vmul.f32 %v2268_v42, %v1047_v34  ;;  %v1049_v5 = vmul.f32 %v1555_v58, %v1021_v63  ;;  %v388_v27 = vld [vmem:[#allocation4] sm:$0x1] }
 0x217   : > { %v2247_v16 = vadd.f32 %v1120_v10, %v1119_v41  ;;  %v1083_v11 = vmul.f32 %v1575_v52, %v1043_v18  ;;  %v1582_v52 = vld [vmem:[%s1786_s18 + $0x78] sm:$0xff] }
 0x218   : > { %v1194_v7 = vsel %vm359_vm2, %v1582_v52, 0.0  ;;  %vm1074_vm7 = vcmp.gt.f32.partialorder %v1582_v52, 0.0 }
 0x219   : > { %v1099_v17 = vsel %vm1067_vm15, %v1083_v11, 0.0 }
 0x21a   : > { %v1122_v26 = vsel %vm359_vm2, %v1099_v17, 0.0 }
 0x21b   : > { %v1123_v30 = vadd.f32 %v1122_v26, %v2247_v16 }
 0x21e   : > { %v2251_v15 = vpop.xlane.xlu0 %944 }
 0x21f   : > { %1562 = vrcp.f32 %v2251_v15 }
 0x222   : > { %v2254_v47 = vpop.xlane.xlu0 %999 }
 0x223   : > { %v1022_v50 = vsub.f32 0.0, %v2254_v47 }
 0x225   : > { %v1051_v47 = vmul.f32 %v1557_v3, %v1022_v50 }
 0x226   : > { %v2258_v2 = vpop.xlane.xlu0 %1005 }
 0x227   : > { %v1024_v61 = vsub.f32 0.0, %v2258_v2 }
 0x22a   : > { %v353_v60 = vpop.xlane.xlu0 %352 }
 0x22b   : > { %v354_v33 = vsub.f32 %v340_v51, %v353_v60  ;;  %v1101_v51 = vsel %vm1069_vm4, %v1085_v20, 0.0  ;;  %v1087_v60 = vmul.f32 %v1579_v35, %v1051_v47 }
 0x22c   : > { %v1126_v42 = vsel %vm359_vm2, %v1101_v51, 0.0 }
 0x22d   : > { %v357_v37 = vmul.f32 %v354_v33, %v1981_v31  ;;  %v1019_v31 = vsub.f32 0.0, %v991_v29  ;;  %v1192_v29 = vsel %vm359_vm2, %v1581_v53, 0.0  ;;  %v1559_v33 = vpop.eup %1558  ;;  %v1103_v8 = vsel %vm1071_vm3, %v1087_v60, 0.0 }
 0x22e   : > { %v1193_v54 = vadd.f32 %v1192_v29, %v1191_v36 }
 0x22f   : > { %v358_v23 = vsel %vm356_vm14, %v357_v37, 0.0  ;;  %v1045_v44 = vmul.f32 %v1551_v25, %v1019_v31  ;;  %v1055_v37 = vmul.f32 %v1559_v33, %v1024_v61  ;;  %v1130_v31 = vsel %vm359_vm2, %v1103_v8, 0.0 }
 0x230   : > { %v360_v46 = vsel %vm359_vm2, %v358_v23, 0.0  ;;  %v1195_v19 = vadd.f32 %v1194_v7, %v1193_v54 }
 0x231   : > { %v361_v6 = vrot.slane %v360_v46, 4  ;;  %v1084_v41 = vmul.f32 %v1576_v39, %v1045_v44  ;;  %v1086_v39 = vmul.f32 %v2275_v48, %v1049_v5  ;;  %v1089_v45 = vmul.f32 %v1581_v53, %v1055_v37 }
 0x232   : > { %v1196_v15 = vrot.slane %v1195_v19, 4 }
 0x233   : > { %v362_v22 = vadd.f32 %v361_v6, %v360_v46  ;;  %v1100_v43 = vsel %vm1068_vm0, %v1084_v41, 0.0  ;;  %v1102_v23 = vsel %vm1070_vm5, %v1086_v39, 0.0  ;;  %v1561_v46 = vpop.eup %1560 }
 0x234   : > { %v1124_v14 = vsel %vm359_vm2, %v1100_v43, 0.0  ;;  %v1128_v28 = vsel %vm359_vm2, %v1102_v23, 0.0  ;;  %v1563_v18 = vpop.eup %1562  ;;  %v1197_v25 = vadd.f32 %v1196_v15, %v1195_v19 }
 0x235   : > { %v363_v12 = vrot.slane %v362_v22, 2  ;;  %v1125_v57 = vadd.f32 %v1124_v14, %v1123_v30 }
 0x237   : > { %v364_v21 = vadd.f32 %v363_v12, %v362_v22  ;;  %v1127_v16 = vadd.f32 %v1126_v42, %v1125_v57  ;;  %v1105_v12 = vsel %vm1073_vm6, %v1089_v45, 0.0 }
 0x238   : > { %v1134_v11 = vsel %vm359_vm2, %v1105_v12, 0.0 }
 0x239   : > { %v365_v4 = vrot.slane %v364_v21, 1  ;;  %v1129_v56 = vadd.f32 %v1128_v28, %v1127_v16 }
 0x23b   : > { %v366_v49 = vadd.f32 %v365_v4, %v364_v21  ;;  %v1131_v0 = vadd.f32 %v1130_v31, %v1129_v56  ;;  %v1198_v4 = vrot.slane %v1197_v25, 2 }
 0x23d   : > { %v374_v10 = vrot.slane %v366_v49, %v2207_v40  ;;  %v1199_v63 = vadd.f32 %v1198_v4, %v1197_v25 }
 0x23f   : > { %v381_v38 = vrot.slane %v374_v10, %v2207_v40  ;;  %v1200_v36 = vrot.slane %v1199_v63, 1 }
 0x241   : > { %382 = vrot.lane.b32.xlu0 %v381_v38, %s1710_s19  ;;  %v1201_v53 = vadd.f32 %v1200_v36, %v1199_v63 }
 0x247   : > { %v1003_v24 = vpop.xlane.xlu1 %1002 }
 0x248   : > { %v1023_v2 = vsub.f32 0.0, %v1003_v24 }
 0x24a   : > { %v1053_v6 = vmul.f32 %v1561_v46, %v1023_v2 }
 0x24b   : > { %v1009_v48 = vpop.xlane.xlu1 %1008 }
 0x24c   : > { %v1088_v59 = vmul.f32 %v2284_v55, %v1053_v6  ;;  %v1025_v22 = vsub.f32 0.0, %v1009_v48 }
 0x24e   : > { %v1104_v35 = vsel %vm1072_vm1, %v1088_v59, 0.0  ;;  %v1057_v9 = vmul.f32 %v1563_v18, %v1025_v22 }
 0x24f   : > { %v1132_v44 = vsel %vm359_vm2, %v1104_v35, 0.0  ;;  %v412_v13 = vpop.permute.xlu1 %411 }
 0x250   : > { %v1133_v21 = vadd.f32 %v1132_v44, %v1131_v0  ;;  %v1090_v62 = vmul.f32 %v1582_v52, %v1057_v9  ;;  %v414_v49 = vadd.f32 %v412_v13, %v388_v27 }
 0x252   : > { %v1106_v1 = vsel %vm1074_vm7, %v1090_v62, 0.0  ;;  %v1135_v32 = vadd.f32 %v1134_v11, %v1133_v21  ;;  %415 = vst.msk [vmem:[#allocation4] sm:$0x1] %vm386_vm8, %v414_v49 }
 0x253   : > { %v1136_v55 = vsel %vm359_vm2, %v1106_v1, 0.0 }
 0x254   : > { %v1137_v41 = vadd.f32 %v1136_v55, %v1135_v32 }
 0x256   : > { %v1138_v34 = vrot.slane %v1137_v41, 4 }
 0x258   : > { %v1139_v17 = vadd.f32 %v1138_v34, %v1137_v41 }
 0x25a   : > { %v1140_v50 = vrot.slane %v1139_v17, 2 }
 0x25c   : > { %v1141_v10 = vadd.f32 %v1140_v50, %v1139_v17 }
 0x25e   : > { %v1142_v58 = vrot.slane %v1141_v10, 1 }
 0x260   : > { %v1143_v29 = vadd.f32 %v1142_v58, %v1141_v10 }
 0x261   : > { %1596 = shalt.err (!%p1593_p13)
}
 0x262   : > { %s1597_s28 = scalar_lea.hbm %s2418_s5, 16 }
 0x263   : > { %p1598_p0 = scmp.ne.s32.totalorder %s2418_s5, %s1597_s28  ;;  %p1603_p3 = scmp.lt.u32.totalorder %s1597_s28, %s2418_s5 }
 0x265   : > { %p1599_p1 = pnand %p1598_p0, %p1406_p6 }
 0x267   : > { %p1600_p2 = pneg %p1599_p1 }
 0x269   : > { %p1605_p4 = pnand %p1603_p3, %p1600_p2 }
 0x26b   : > { %1608 = shalt.err (!%p1605_p4)
}
 0x26c   : > { %1393 = dma.vmem_to_hbm [thread:$0]  (%p1406_p6), %s1241_s21, 16, %s2418_s5, [#allocation5]   ;;  %v1151_v43 = vrot.slane %v1143_v29, %v2207_v40  ;;  %v1209_v3 = vrot.slane %v1201_v53, %v2207_v40  ;;  %v355_v20 = vld [vmem:[#allocation2] sm:$0x1] }
 0x26d   : > { %s1712_s12 = smov [#allocation2]  }
 0x26e   : > { %v1158_v26 = vrot.slane %v1151_v43, %v2207_v40  ;;  %v1216_v38 = vrot.slane %v1209_v3, %v2207_v40  ;;  %s1229_s13 = sshll.u32 %s1712_s12, 4  ;;  %s1230_s13 = int_to_ptr.vmem [resolvable:$true] %s1229_s13 }
 0x26f   : > { %s1609_s14 = scalar_lea.vmem %s1230_s13, 16  ;;  %s1615_s15 = scalar_lea.vmem %s1230_s13, 32 }
 0x270   : > { %1159 = vrot.lane.b32.xlu1 %v1158_v26, %s1710_s19  ;;  %p1610_p5 = scmp.ne.s32.totalorder %s1230_s13, %s1609_s14  ;;  %p1616_p9 = scmp.lt.s32.totalorder %s1230_s13, %s1230_s13 }
 0x271   : > { %p1617_p10 = scmp.lt.s32.totalorder %s1615_s15, %s1609_s14 }
 0x272   : > { %p1611_p7 = pnand %p1610_p5, %p1406_p6 }
 0x273   : > { %p1618_p11 = por %p1617_p10, %p1616_p9 }
 0x274   : > { %1217 = vrot.lane.b32.xlu1 %v1216_v38, %s1710_s19  ;;  %p1612_p8 = pneg %p1611_p7 }
 0x276   : > { %p1619_p12 = pnand %p1618_p11, %p1612_p8 }
 0x2b3   : > { %v383_v5 = vpop.permute.xlu0 %382 }
 0x2b4   : > { %v385_v47 = vadd.f32 %v383_v5, %v355_v20 }
 0x2b6   : > { %387 = vst.msk [vmem:[#allocation2] sm:$0x1] %vm386_vm8, %v385_v47 }
 0x2b7   : > { %1622 = shalt.err (!%p1619_p12)
}
 0x2b8   : > { %s1623_s18 = scalar_lea.hbm %s2417_s4, 16 }
 0x2b9   : > { %p1624_p13 = scmp.ne.s32.totalorder %s2417_s4, %s1623_s18  ;;  %p1629_p2 = scmp.lt.u32.totalorder %s1623_s18, %s2417_s4 }
 0x2bb   : > { %p1625_p0 = pnand %p1624_p13, %p1406_p6 }
 0x2bd   : > { %p1626_p1 = pneg %p1625_p0 }
 0x2bf   : > { %p1631_p3 = pnand %p1629_p2, %p1626_p1 }
 0x2c1   : > { %1634 = shalt.err (!%p1631_p3)
}
 0x2c2   : > { %1391 = dma.vmem_to_hbm [thread:$0]  (%p1406_p6), %s1230_s13, 16, %s2417_s4, [#allocation3]   ;;  %v1058_v40 = vld [vmem:[#allocation6] sm:$0x1]  ;;  %v1164_v52 = vld [vmem:[#allocation7] sm:$0x1] }
 0x2c3   : > { %s1713_s27 = smov [#allocation6]   ;;  %s1714_s29 = smov [#allocation7]  }
 0x2c4   : > { %s1251_s28 = sshll.u32 %s1713_s27, 4  ;;  %s1262_s30 = sshll.u32 %s1714_s29, 4  ;;  %s1252_s28 = int_to_ptr.vmem [resolvable:$true] %s1251_s28  ;;  %s1263_s30 = int_to_ptr.vmem [resolvable:$true] %s1262_s30 }
 0x2c5   : > { %s1635_s8 = scalar_lea.vmem %s1252_s28, 16  ;;  %s1641_s9 = scalar_lea.vmem %s1252_s28, 32 }
 0x2c6   : > { %p1636_p4 = scmp.ne.s32.totalorder %s1252_s28, %s1635_s8  ;;  %p1642_p8 = scmp.lt.s32.totalorder %s1252_s28, %s1252_s28 }
 0x2c7   : > { %p1643_p9 = scmp.lt.s32.totalorder %s1641_s9, %s1635_s8 }
 0x2c8   : > { %p1637_p5 = pnand %p1636_p4, %p1406_p6 }
 0x2c9   : > { %p1644_p10 = por %p1643_p9, %p1642_p8 }
 0x2ca   : > { %p1638_p7 = pneg %p1637_p5 }
 0x2cc   : > { %p1645_p11 = pnand %p1644_p10, %p1638_p7 }
 0x2e2   : > { %v1160_v54 = vpop.permute.xlu1 %1159 }
 0x2e3   : > { %v1162_v14 = vadd.f32 %v1160_v54, %v1058_v40 }
 0x2e5   : > { %1163 = vst.msk [vmem:[#allocation6] sm:$0x1] %vm386_vm8, %v1162_v14 }
 0x2e6   : > { %v1218_v7 = vpop.permute.xlu1 %1217 }
 0x2e7   : > { %1648 = shalt.err (!%p1645_p11)
}
 0x2e8   : > { %s1649_s12 = scalar_lea.hbm %s2419_s6, 16 }
 0x2e9   : > { %p1650_p12 = scmp.ne.s32.totalorder %s2419_s6, %s1649_s12  ;;  %p1655_p1 = scmp.lt.u32.totalorder %s1649_s12, %s2419_s6 }
 0x2eb   : > { %p1651_p13 = pnand %p1650_p12, %p1406_p6 }
 0x2ed   : > { %p1652_p0 = pneg %p1651_p13 }
 0x2ef   : > { %p1657_p2 = pnand %p1655_p1, %p1652_p0 }
 0x2f1   : > { %1660 = shalt.err (!%p1657_p2)
}
 0x2f2   : > { %1395 = dma.vmem_to_hbm [thread:$0]  (%p1406_p6), %s1252_s28, 16, %s2419_s6, [#allocation5]   ;;  %v1220_v30 = vadd.f32 %v1218_v7, %v1164_v52 }
 0x2f3   : > { %s1661_s19 = scalar_lea.vmem %s1263_s30, 16  ;;  %s1667_s20 = scalar_lea.vmem %s1263_s30, 32 }
 0x2f4   : > { %1221 = vst.msk [vmem:[#allocation7] sm:$0x1] %vm386_vm8, %v1220_v30  ;;  %p1662_p3 = scmp.ne.s32.totalorder %s1263_s30, %s1661_s19  ;;  %p1668_p7 = scmp.lt.s32.totalorder %s1263_s30, %s1263_s30 }
 0x2f5   : > { %p1669_p8 = scmp.lt.s32.totalorder %s1667_s20, %s1661_s19 }
 0x2f6   : > { %p1663_p4 = pnand %p1662_p3, %p1406_p6 }
 0x2f7   : > { %p1670_p9 = por %p1669_p8, %p1668_p7 }
 0x2f8   : > { %p1664_p5 = pneg %p1663_p4 }
 0x2fa   : > { %p1671_p10 = pnand %p1670_p9, %p1664_p5 }
 0x2fc   : > { %1674 = shalt.err (!%p1671_p10)
}
 0x2fd   : > { %s1675_s23 = scalar_lea.hbm %s2420_s7, 16 }
 0x2fe   : > { %p1676_p11 = scmp.ne.s32.totalorder %s2420_s7, %s1675_s23  ;;  %p1681_p0 = scmp.lt.u32.totalorder %s1675_s23, %s2420_s7 }
 0x300   : > { %p1677_p12 = pnand %p1676_p11, %p1406_p6 }
 0x302   : > { %p1678_p13 = pneg %p1677_p12 }
 0x304   : > { %p1683_p1 = pnand %p1681_p0, %p1678_p13 }
 0x306   : > { %1686 = shalt.err (!%p1683_p1)
}
 0x307   : > { %1397 = dma.vmem_to_hbm [thread:$0]  (%p1406_p6), %s1263_s30, 16, %s2420_s7, [#allocation8]  }
 0x308   : > { %1692 = dma.done.wait (%p1406_p6), [#allocation3], 16  }
 0x309   : > { %1694 = vsyncadd (%p1406_p6), [#allocation3], 4294967280 }
 0x30a   : > { %1696 = dma.done.wait (%p1406_p6), [#allocation5], 32  }
 0x30b   : > { %1698 = vsyncadd (%p1406_p6), [#allocation5], 4294967264 }
 0x30c   : > { %1700 = dma.done.wait (%p1406_p6), [#allocation8], 16  }
 0x30d   : > { %1702 = vsyncadd (%p1406_p6), [#allocation8], 4294967280 }
 0x30e PF: > { %s21_s24 = sadd.s32 1, %s1705_s24  }
 0x30f   : > { %p18_p2 = scmp.ge.s32.totalorder %s21_s24, 4  }
 0x311   :  { %20 = sbr.rel (!%p18_p2) target bundleno = 3 (0x3), region = 100 }
 0x318   :  { %1287 = vsyncpa [#allocation3], 1 }
 0x319   :  { %1289 = vsyncpa [#allocation3 + $0x1], 1 }
 0x31a   :  { %1290 = vsyncpa [#allocation5], 1 }
 0x31b   :  { %1291 = vsyncpa [#allocation8], 1 }

</bundles_post_ra>
